<compile_context>
chip_gen: v5e
topology: v5e:2x2
jax: 0.10.0
libtpu: 0.0.40
codegen_flags: <defaults>
</compile_context>

<pallas_src>
import jax
import jax.numpy as jnp
from jax.experimental import pallas as pl
from jax.experimental.pallas import tpu as pltpu

D_MODEL = 512          # net output feature dim (2*512 = 1024 for the head)
D_FFN = 128            # gMLP ffn half-width (proj_in maps to 2*D_FFN)
SEQ = 8                # sequence length
BATCH = 2
FC_HIDDEN = 256        # Linear(1024, 256)
EPS = 1e-5             # nn.LayerNorm default eps
HEAD_PAD = 128         # lane-dense padding of the 2-class output
POOL_ROWS = 8          # pooled rows per input (padded to a full sublane tile)


# ----------------------------- kernel --------------------------------------


def _layernorm(x, gamma, beta):
    mu = jnp.mean(x, axis=-1, keepdims=True)
    var = jnp.mean(jnp.square(x - mu), axis=-1, keepdims=True)
    return (x - mu) * jax.lax.rsqrt(var + EPS) * gamma + beta


def fused_kernel(xs_ref, slab_ref, w_in_ref, sp_ref, bsp_ref,
                 w_out_ref, fc_w_ref, fc1_w_ref, o_ref):
    T = bsp_ref.shape[0]                         # 2*B*S stacked tokens

    xt = xs_ref[...]                             # (T, D) f32

    # ---- carve the packed f32 bias/LN slab (static row/lane slices) ----
    ln1_g = slab_ref[0:1, :]                     # (1, 512)
    ln1_b = slab_ref[1:2, :]
    b_in = slab_ref[2:3, :2 * D_FFN]             # (1, 256)
    sgu_g = slab_ref[3:4, :D_FFN]                # (1, 128)
    sgu_b = slab_ref[4:5, :D_FFN]
    b_out = slab_ref[5:6, :]                     # (1, 512)
    fc_b = slab_ref[6:7, :FC_HIDDEN]             # (1, 256)
    fc1_b = slab_ref[7:8, :HEAD_PAD]             # (1, 128)

    # ---- gMLP block (weights shared between x1 and x2) ----
    h = _layernorm(xt, ln1_g, ln1_b)
    u = jnp.dot(h.astype(jnp.bfloat16), w_in_ref[...],
                preferred_element_type=jnp.float32) + b_in        # (T, 2F)
    # TODO(synk): PyTorch F.gelu defaults to exact erf; tanh approx used here.
    u = jax.nn.gelu(u, approximate=True)
    u1 = u[:, :D_FFN]                                             # (T, F)
    v = _layernorm(u[:, D_FFN:], sgu_g, sgu_b)                    # (T, F)
    # spatial gating: block-diagonal (T, T) matmul over the stacked axis,
    # bf16 single-pass MXU, dense pre-broadcast bias add on the VPU.
    v = jnp.dot(sp_ref[:T, :], v.astype(jnp.bfloat16),
                preferred_element_type=jnp.float32) + bsp_ref[...]
    gated = u1 * v                                                # (T, F)
    y = xt + jnp.dot(gated.astype(jnp.bfloat16), w_out_ref[...],
                     preferred_element_type=jnp.float32) + b_out  # residual

    # ---- classification head ----
    # one fused pooling matmul: rows 0:POOL_ROWS pool x1, rows POOL_ROWS: pool x2
    pooled = jnp.dot(sp_ref[T:, :], y.astype(jnp.bfloat16),
                     preferred_element_type=jnp.float32)          # (2P, D)
    m1 = pooled[:POOL_ROWS].astype(jnp.bfloat16)                  # (P, D)
    m2 = pooled[POOL_ROWS:].astype(jnp.bfloat16)                  # (P, D)
    # emb @ fc_w == m1 @ fc_w[:D] + m2 @ fc_w[D:]  (no lane concat)
    emb = (jnp.dot(m1, fc_w_ref[:D_MODEL, :],
                   preferred_element_type=jnp.float32)
           + jnp.dot(m2, fc_w_ref[D_MODEL:, :],
                     preferred_element_type=jnp.float32)
           + fc_b)                                                # (P, 256)
    out = jnp.dot(emb.astype(jnp.bfloat16), fc1_w_ref[...],
                  preferred_element_type=jnp.float32) + fc1_b     # (P, 128)
    o_ref[...] = out                                              # unmasked vst


# ----------------------------- wrapper --------------------------------------


def gmlp_classification(x1, x2, kp):
    B, S, D = x1.shape
    # stack both inputs into one lane-dense (2*B*S, D) token matrix
    xs = jnp.concatenate([x1.reshape(B * S, D), x2.reshape(B * S, D)], axis=0)
    operands = (xs, kp["slab"], kp["w_in"], kp["sp_mats"], kp["bsp"],
                kp["w_out"], kp["fc_w"], kp["fc1_w"])
    vmem = lambda: pl.BlockSpec(memory_space=pltpu.MemorySpace.VMEM)
    out = pl.pallas_call(
        fused_kernel,
        out_shape=jax.ShapeDtypeStruct((POOL_ROWS, HEAD_PAD), jnp.float32),
        in_specs=[vmem() for _ in operands],
        out_specs=vmem(),
    )(*operands)
    return out[:B, :2]


# ----------------------------- params ---------------------------------------


def init_params(key):
    ks = jax.random.split(key, 6)
    scale = 0.02
    net = {
        "ln1_g": jnp.ones((D_MODEL,), jnp.float32),
        "ln1_b": jnp.zeros((D_MODEL,), jnp.float32),
        # nn.Linear weights stored pre-transposed to (in, out)
        "w_in": scale * jax.random.normal(ks[0], (D_MODEL, 2 * D_FFN),
                                          jnp.float32),
        "b_in": jnp.zeros((2 * D_FFN,), jnp.float32),
        "sgu_g": jnp.ones((D_FFN,), jnp.float32),
        "sgu_b": jnp.zeros((D_FFN,), jnp.float32),
        # spatial proj initialised near-zero with bias=1 (standard gMLP init)
        "w_sp": scale * jax.random.normal(ks[1], (SEQ, SEQ), jnp.float32),
        "b_sp": jnp.ones((SEQ,), jnp.float32),
        "w_out": scale * jax.random.normal(ks[2], (D_FFN, D_MODEL),
                                           jnp.float32),
        "b_out": jnp.zeros((D_MODEL,), jnp.float32),
    }
    head = {
        # nn.Linear(1024, 256): weight (256,1024) stored transposed (1024,256)
        "fc_w": scale * jax.random.normal(ks[3], (2 * D_MODEL, FC_HIDDEN),
                                          jnp.float32),
        "fc_b": scale * jax.random.normal(ks[4], (FC_HIDDEN,), jnp.float32),
        # nn.Linear(256, 2): weight (2,256) stored transposed (256,2)
        "fc1_w": scale * jax.random.normal(ks[5], (FC_HIDDEN, 2), jnp.float32),
        "fc1_b": jnp.zeros((2,), jnp.float32),
    }
    return net, head


def prepare_kernel_params(net, head, batch):
    """Pre-pack parameters into the layouts the fused kernel consumes."""
    nb = 2 * batch                     # x1-batch + x2-batch
    T = nb * SEQ                       # stacked token count

    # --- (8, 512) f32 slab of every 1-row parameter ---------------------
    def row(vec):
        r = jnp.zeros((D_MODEL,), jnp.float32)
        return r.at[:vec.shape[0]].set(vec.astype(jnp.float32))

    slab = jnp.stack([
        row(net["ln1_g"]),   # 0
        row(net["ln1_b"]),   # 1
        row(net["b_in"]),    # 2 (first 256 lanes)
        row(net["sgu_g"]),   # 3 (first 128 lanes)
        row(net["sgu_b"]),   # 4
        row(net["b_out"]),   # 5
        row(head["fc_b"]),   # 6 (first 256 lanes)
        row(head["fc1_b"]),  # 7 (first 2 lanes)
    ], axis=0)                                                  # (8, 512)

    # --- block-diag spatial proj + fused pooling matrix, bf16 (48, 32) ---
    eye = jnp.eye(nb, dtype=jnp.float32)
    wsp_bd = jnp.kron(eye, net["w_sp"])                         # (T, T)
    seq_pool = jnp.kron(eye, jnp.full((1, SEQ), 1.0 / SEQ, jnp.float32))
    pool = jnp.zeros((2 * POOL_ROWS, T), jnp.float32)
    pool = pool.at[:batch, :].set(seq_pool[:batch])             # x1 means
    pool = pool.at[POOL_ROWS:POOL_ROWS + batch, :].set(seq_pool[batch:])
    sp_mats = jnp.concatenate([wsp_bd, pool], axis=0).astype(jnp.bfloat16)

    # --- dense pre-broadcast SGU bias (T, D_FFN) f32 ----------------------
    bsp = jnp.tile(net["b_sp"].reshape(SEQ, 1), (nb, D_FFN))    # (32, 128)

    # Linear(256, 2) padded to 128 lanes for a lane-dense output store
    fc1_w = jnp.zeros((FC_HIDDEN, HEAD_PAD), jnp.bfloat16)
    fc1_w = fc1_w.at[:, :2].set(head["fc1_w"].astype(jnp.bfloat16))

    return {
        "slab": slab,
        "sp_mats": sp_mats,
        "bsp": bsp,
        "w_in": net["w_in"].astype(jnp.bfloat16),
        "w_out": net["w_out"].astype(jnp.bfloat16),
        "fc_w": head["fc_w"].astype(jnp.bfloat16),
        "fc1_w": fc1_w,
    }


# ----------------------------- main -----------------------------------------

if __name__ == "__main__":
    key = jax.random.PRNGKey(0)
    k1, k2, kp = jax.random.split(key, 3)
    x1 = jax.random.normal(k1, (BATCH, SEQ, D_MODEL), jnp.float32)
    x2 = jax.random.normal(k2, (BATCH, SEQ, D_MODEL), jnp.float32)
    net_params, head_params = init_params(kp)
    kparams = prepare_kernel_params(net_params, head_params, BATCH)

    out = jax.jit(gmlp_classification)(x1, x2, kparams)
    out = jax.block_until_ready(out)
    assert out.shape == (BATCH, 2) and out.dtype == jnp.float32
    print("KERNEL_OK")
</pallas_src>

<mosaic_0001>
module attributes {stable_mosaic.version = 11 : i64} {
  func.func @fused_kernel(%arg0: memref<32x512xf32, #tpu.memory_space<vmem>>, %arg1: memref<8x512xf32, #tpu.memory_space<vmem>>, %arg2: memref<512x256xbf16, #tpu.memory_space<vmem>>, %arg3: memref<48x32xbf16, #tpu.memory_space<vmem>>, %arg4: memref<32x128xf32, #tpu.memory_space<vmem>>, %arg5: memref<128x512xbf16, #tpu.memory_space<vmem>>, %arg6: memref<1024x256xbf16, #tpu.memory_space<vmem>>, %arg7: memref<256x128xbf16, #tpu.memory_space<vmem>>, %arg8: memref<8x128xf32, #tpu.memory_space<vmem>>) attributes {dimension_semantics = [], scalar_prefetch = 0 : i64, scratch_operands = 0 : i64, tpu.core_type = #tpu.core_type<tc>} {
    %c0 = arith.constant 0 : index
    %c0_0 = arith.constant 0 : index
    %0 = vector.load %arg0[%c0, %c0_0] : memref<32x512xf32, #tpu.memory_space<vmem>>, vector<32x512xf32>
    %c0_1 = arith.constant 0 : index
    %c0_2 = arith.constant 0 : index
    %1 = vector.load %arg1[%c0_1, %c0_2] : memref<8x512xf32, #tpu.memory_space<vmem>>, vector<1x512xf32>
    %c1 = arith.constant 1 : index
    %c0_3 = arith.constant 0 : index
    %2 = vector.load %arg1[%c1, %c0_3] : memref<8x512xf32, #tpu.memory_space<vmem>>, vector<1x512xf32>
    %c2 = arith.constant 2 : index
    %c0_4 = arith.constant 0 : index
    %3 = vector.load %arg1[%c2, %c0_4] : memref<8x512xf32, #tpu.memory_space<vmem>>, vector<1x256xf32>
    %c3 = arith.constant 3 : index
    %c0_5 = arith.constant 0 : index
    %4 = vector.load %arg1[%c3, %c0_5] : memref<8x512xf32, #tpu.memory_space<vmem>>, vector<1x128xf32>
    %c4 = arith.constant 4 : index
    %c0_6 = arith.constant 0 : index
    %5 = vector.load %arg1[%c4, %c0_6] : memref<8x512xf32, #tpu.memory_space<vmem>>, vector<1x128xf32>
    %c5 = arith.constant 5 : index
    %c0_7 = arith.constant 0 : index
    %6 = vector.load %arg1[%c5, %c0_7] : memref<8x512xf32, #tpu.memory_space<vmem>>, vector<1x512xf32>
    %c6 = arith.constant 6 : index
    %c0_8 = arith.constant 0 : index
    %7 = vector.load %arg1[%c6, %c0_8] : memref<8x512xf32, #tpu.memory_space<vmem>>, vector<1x256xf32>
    %c7 = arith.constant 7 : index
    %c0_9 = arith.constant 0 : index
    %8 = vector.load %arg1[%c7, %c0_9] : memref<8x512xf32, #tpu.memory_space<vmem>>, vector<1x128xf32>
    %cst = arith.constant dense<0.000000e+00> : vector<32xf32>
    %9 = vector.multi_reduction <add>, %0, %cst [1] : vector<32x512xf32> to vector<32xf32>
    %10 = vector.shape_cast %9 : vector<32xf32> to vector<32x1xf32>
    %cst_10 = arith.constant 5.120000e+02 : f32
    %11 = vector.broadcast %cst_10 : f32 to vector<32x1xf32>
    %12 = arith.divf %10, %11 : vector<32x1xf32>
    %13 = vector.broadcast %12 : vector<32x1xf32> to vector<32x512xf32>
    %14 = arith.subf %0, %13 : vector<32x512xf32>
    %15 = arith.mulf %14, %14 : vector<32x512xf32>
    %cst_11 = arith.constant dense<0.000000e+00> : vector<32xf32>
    %16 = vector.multi_reduction <add>, %15, %cst_11 [1] : vector<32x512xf32> to vector<32xf32>
    %17 = vector.shape_cast %16 : vector<32xf32> to vector<32x1xf32>
    %cst_12 = arith.constant 5.120000e+02 : f32
    %18 = vector.broadcast %cst_12 : f32 to vector<32x1xf32>
    %19 = arith.divf %17, %18 : vector<32x1xf32>
    %20 = vector.broadcast %12 : vector<32x1xf32> to vector<32x512xf32>
    %21 = arith.subf %0, %20 : vector<32x512xf32>
    %cst_13 = arith.constant 9.99999974E-6 : f32
    %22 = vector.broadcast %cst_13 : f32 to vector<32x1xf32>
    %23 = arith.addf %19, %22 : vector<32x1xf32>
    %24 = math.rsqrt %23 : vector<32x1xf32>
    %25 = vector.broadcast %24 : vector<32x1xf32> to vector<32x512xf32>
    %26 = arith.mulf %21, %25 : vector<32x512xf32>
    %27 = vector.broadcast %1 : vector<1x512xf32> to vector<32x512xf32>
    %28 = arith.mulf %26, %27 : vector<32x512xf32>
    %29 = vector.broadcast %2 : vector<1x512xf32> to vector<32x512xf32>
    %30 = arith.addf %28, %29 : vector<32x512xf32>
    %31 = arith.truncf %30 : vector<32x512xf32> to vector<32x512xbf16>
    %c0_14 = arith.constant 0 : index
    %c0_15 = arith.constant 0 : index
    %32 = vector.load %arg2[%c0_14, %c0_15] : memref<512x256xbf16, #tpu.memory_space<vmem>>, vector<512x256xbf16>
    %cst_16 = arith.constant dense<0.000000e+00> : vector<32x256xf32>
    %33 = tpu.matmul %31, %32, %cst_16 {dimension_numbers = #tpu.dot_dimension_numbers<[1], [0], [0], [1], [0, 0, 1, 1], [], []>} : vector<32x512xbf16>, vector<512x256xbf16>, vector<32x256xf32> -> vector<32x256xf32>
    %34 = vector.broadcast %3 : vector<1x256xf32> to vector<32x256xf32>
    %35 = arith.addf %33, %34 : vector<32x256xf32>
    %36 = arith.mulf %35, %35 : vector<32x256xf32>
    %37 = arith.mulf %35, %36 : vector<32x256xf32>
    %cst_17 = arith.constant 4.471500e-02 : f32
    %38 = vector.broadcast %cst_17 : f32 to vector<32x256xf32>
    %39 = arith.mulf %38, %37 : vector<32x256xf32>
    %40 = arith.addf %35, %39 : vector<32x256xf32>
    %cst_18 = arith.constant 0.797884583 : f32
    %41 = vector.broadcast %cst_18 : f32 to vector<32x256xf32>
    %42 = arith.mulf %41, %40 : vector<32x256xf32>
    %43 = math.tanh %42 : vector<32x256xf32>
    %cst_19 = arith.constant 1.000000e+00 : f32
    %44 = vector.broadcast %cst_19 : f32 to vector<32x256xf32>
    %45 = arith.addf %44, %43 : vector<32x256xf32>
    %cst_20 = arith.constant 5.000000e-01 : f32
    %46 = vector.broadcast %cst_20 : f32 to vector<32x256xf32>
    %47 = arith.mulf %46, %45 : vector<32x256xf32>
    %48 = arith.mulf %35, %47 : vector<32x256xf32>
    %49 = vector.extract_strided_slice %48 {offsets = [0, 0], sizes = [32, 128], strides = [1, 1]} : vector<32x256xf32> to vector<32x128xf32>
    %50 = vector.extract_strided_slice %48 {offsets = [0, 128], sizes = [32, 128], strides = [1, 1]} : vector<32x256xf32> to vector<32x128xf32>
    %cst_21 = arith.constant dense<0.000000e+00> : vector<32xf32>
    %51 = vector.multi_reduction <add>, %50, %cst_21 [1] : vector<32x128xf32> to vector<32xf32>
    %52 = vector.shape_cast %51 : vector<32xf32> to vector<32x1xf32>
    %cst_22 = arith.constant 1.280000e+02 : f32
    %53 = vector.broadcast %cst_22 : f32 to vector<32x1xf32>
    %54 = arith.divf %52, %53 : vector<32x1xf32>
    %55 = vector.broadcast %54 : vector<32x1xf32> to vector<32x128xf32>
    %56 = arith.subf %50, %55 : vector<32x128xf32>
    %57 = arith.mulf %56, %56 : vector<32x128xf32>
    %cst_23 = arith.constant dense<0.000000e+00> : vector<32xf32>
    %58 = vector.multi_reduction <add>, %57, %cst_23 [1] : vector<32x128xf32> to vector<32xf32>
    %59 = vector.shape_cast %58 : vector<32xf32> to vector<32x1xf32>
    %cst_24 = arith.constant 1.280000e+02 : f32
    %60 = vector.broadcast %cst_24 : f32 to vector<32x1xf32>
    %61 = arith.divf %59, %60 : vector<32x1xf32>
    %62 = vector.broadcast %54 : vector<32x1xf32> to vector<32x128xf32>
    %63 = arith.subf %50, %62 : vector<32x128xf32>
    %cst_25 = arith.constant 9.99999974E-6 : f32
    %64 = vector.broadcast %cst_25 : f32 to vector<32x1xf32>
    %65 = arith.addf %61, %64 : vector<32x1xf32>
    %66 = math.rsqrt %65 : vector<32x1xf32>
    %67 = vector.broadcast %66 : vector<32x1xf32> to vector<32x128xf32>
    %68 = arith.mulf %63, %67 : vector<32x128xf32>
    %69 = vector.broadcast %4 : vector<1x128xf32> to vector<32x128xf32>
    %70 = arith.mulf %68, %69 : vector<32x128xf32>
    %71 = vector.broadcast %5 : vector<1x128xf32> to vector<32x128xf32>
    %72 = arith.addf %70, %71 : vector<32x128xf32>
    %c0_26 = arith.constant 0 : index
    %c0_27 = arith.constant 0 : index
    %73 = vector.load %arg3[%c0_26, %c0_27] : memref<48x32xbf16, #tpu.memory_space<vmem>>, vector<32x32xbf16>
    %74 = arith.truncf %72 : vector<32x128xf32> to vector<32x128xbf16>
    %cst_28 = arith.constant dense<0.000000e+00> : vector<32x128xf32>
    %75 = tpu.matmul %73, %74, %cst_28 {dimension_numbers = #tpu.dot_dimension_numbers<[1], [0], [0], [1], [0, 0, 1, 1], [], []>} : vector<32x32xbf16>, vector<32x128xbf16>, vector<32x128xf32> -> vector<32x128xf32>
    %c0_29 = arith.constant 0 : index
    %c0_30 = arith.constant 0 : index
    %76 = vector.load %arg4[%c0_29, %c0_30] : memref<32x128xf32, #tpu.memory_space<vmem>>, vector<32x128xf32>
    %77 = arith.addf %75, %76 : vector<32x128xf32>
    %78 = arith.mulf %49, %77 : vector<32x128xf32>
    %79 = arith.truncf %78 : vector<32x128xf32> to vector<32x128xbf16>
    %c0_31 = arith.constant 0 : index
    %c0_32 = arith.constant 0 : index
    %80 = vector.load %arg5[%c0_31, %c0_32] : memref<128x512xbf16, #tpu.memory_space<vmem>>, vector<128x512xbf16>
    %cst_33 = arith.constant dense<0.000000e+00> : vector<32x512xf32>
    %81 = tpu.matmul %79, %80, %cst_33 {dimension_numbers = #tpu.dot_dimension_numbers<[1], [0], [0], [1], [0, 0, 1, 1], [], []>} : vector<32x128xbf16>, vector<128x512xbf16>, vector<32x512xf32> -> vector<32x512xf32>
    %82 = arith.addf %0, %81 : vector<32x512xf32>
    %83 = vector.broadcast %6 : vector<1x512xf32> to vector<32x512xf32>
    %84 = arith.addf %82, %83 : vector<32x512xf32>
    %c32 = arith.constant 32 : index
    %c0_34 = arith.constant 0 : index
    %85 = vector.load %arg3[%c32, %c0_34] : memref<48x32xbf16, #tpu.memory_space<vmem>>, vector<16x32xbf16>
    %86 = arith.truncf %84 : vector<32x512xf32> to vector<32x512xbf16>
    %cst_35 = arith.constant dense<0.000000e+00> : vector<16x512xf32>
    %87 = tpu.matmul %85, %86, %cst_35 {dimension_numbers = #tpu.dot_dimension_numbers<[1], [0], [0], [1], [0, 0, 1, 1], [], []>} : vector<16x32xbf16>, vector<32x512xbf16>, vector<16x512xf32> -> vector<16x512xf32>
    %88 = vector.extract_strided_slice %87 {offsets = [0, 0], sizes = [8, 512], strides = [1, 1]} : vector<16x512xf32> to vector<8x512xf32>
    %89 = arith.truncf %88 : vector<8x512xf32> to vector<8x512xbf16>
    %90 = vector.extract_strided_slice %87 {offsets = [8, 0], sizes = [8, 512], strides = [1, 1]} : vector<16x512xf32> to vector<8x512xf32>
    %91 = arith.truncf %90 : vector<8x512xf32> to vector<8x512xbf16>
    %c0_36 = arith.constant 0 : index
    %c0_37 = arith.constant 0 : index
    %92 = vector.load %arg6[%c0_36, %c0_37] : memref<1024x256xbf16, #tpu.memory_space<vmem>>, vector<512x256xbf16>
    %cst_38 = arith.constant dense<0.000000e+00> : vector<8x256xf32>
    %93 = tpu.matmul %89, %92, %cst_38 {dimension_numbers = #tpu.dot_dimension_numbers<[1], [0], [0], [1], [0, 0, 1, 1], [], []>} : vector<8x512xbf16>, vector<512x256xbf16>, vector<8x256xf32> -> vector<8x256xf32>
    %c512 = arith.constant 512 : index
    %c0_39 = arith.constant 0 : index
    %94 = vector.load %arg6[%c512, %c0_39] : memref<1024x256xbf16, #tpu.memory_space<vmem>>, vector<512x256xbf16>
    %cst_40 = arith.constant dense<0.000000e+00> : vector<8x256xf32>
    %95 = tpu.matmul %91, %94, %cst_40 {dimension_numbers = #tpu.dot_dimension_numbers<[1], [0], [0], [1], [0, 0, 1, 1], [], []>} : vector<8x512xbf16>, vector<512x256xbf16>, vector<8x256xf32> -> vector<8x256xf32>
    %96 = arith.addf %93, %95 : vector<8x256xf32>
    %97 = vector.broadcast %7 : vector<1x256xf32> to vector<8x256xf32>
    %98 = arith.addf %96, %97 : vector<8x256xf32>
    %99 = arith.truncf %98 : vector<8x256xf32> to vector<8x256xbf16>
    %c0_41 = arith.constant 0 : index
    %c0_42 = arith.constant 0 : index
    %100 = vector.load %arg7[%c0_41, %c0_42] : memref<256x128xbf16, #tpu.memory_space<vmem>>, vector<256x128xbf16>
    %cst_43 = arith.constant dense<0.000000e+00> : vector<8x128xf32>
    %101 = tpu.matmul %99, %100, %cst_43 {dimension_numbers = #tpu.dot_dimension_numbers<[1], [0], [0], [1], [0, 0, 1, 1], [], []>} : vector<8x256xbf16>, vector<256x128xbf16>, vector<8x128xf32> -> vector<8x128xf32>
    %102 = vector.broadcast %8 : vector<1x128xf32> to vector<8x128xf32>
    %103 = arith.addf %101, %102 : vector<8x128xf32>
    %c0_44 = arith.constant 0 : index
    %c0_45 = arith.constant 0 : index
    %104 = vector.load %arg8[%c0_44, %c0_45] : memref<8x128xf32, #tpu.memory_space<vmem>>, vector<8x128xf32>
    tpu.vector_store %arg8[%c0_44, %c0_45], %103 {strides = array<i32>} : memref<8x128xf32, #tpu.memory_space<vmem>>, vector<8x128xf32>,
    return
  }
}

</mosaic_0001>

<bundles_post_ra>
// kernel: gmlp_classification.1
= control target key start
LH: loop header
LB: loop body
LE: loop exit
PB: predicated region body
PF: predicated region fallthrough
CT: control target
= control target key end

     0   :  { %13 = vsyncpa [#allocation3], 0  ;;  %s4728_s0 = inlined_call_operand.vmem [shape: f32[32,512], index: 0, kind: input, shape index: {}]   ;;  %s4729_s1 = inlined_call_operand.vmem [shape: f32[8,512], index: 1, kind: input, shape index: {}]   ;;  %s4730_s2 = inlined_call_operand.hbm [shape: bf16[512,256], index: 2, kind: input, shape index: {}]   ;;  %s4731_s3 = inlined_call_operand.vmem [shape: bf16[48,32], index: 3, kind: input, shape index: {}]   ;;  %s4732_s4 = inlined_call_operand.hbm [shape: f32[32,128], index: 4, kind: input, shape index: {}]   ;;  %s4733_s5 = inlined_call_operand.vmem [shape: bf16[128,512], index: 5, kind: input, shape index: {}]   ;;  %s4734_s6 = inlined_call_operand.hbm [shape: bf16[1024,256], index: 6, kind: input, shape index: {}]   ;;  %s4735_s7 = inlined_call_operand.hbm [shape: bf16[256,128], index: 7, kind: input, shape index: {}]   ;;  %s4736_s8 = inlined_call_operand.vmem [shape: f32[8,128], index: 8, kind: output, shape index: {}]  }
   0x1   :  { %14 = vsyncpa [#allocation5], 0 }
   0x2   :  { %15 = vsyncpa [#allocation8], 0  ;;  %s39_s29 = sshll.u32 %s4732_s4, 4  ;;  %s4013_s30 = smov [#allocation4]   ;;  %s40_s29 = int_to_ptr.hbm [resolvable:$true] %s39_s29 }
   0x3   :  { %s41_s9 = sshll.u32 %s4013_s30, 4  ;;  %s24_s12 = sshll.u32 %s4730_s2, 4  ;;  %s42_s9 = int_to_ptr.vmem [resolvable:$true] %s41_s9  ;;  %s25_s12 = int_to_ptr.hbm [resolvable:$true] %s24_s12 }
   0x4   :  { %s4014_s13 = smov 128   ;;  %s4015_s14 = smov 8  }
   0x5   :  { %47 = dma.hbm_to_vmem [thread:$0]  %s40_s29, 512, %s42_s9, [#allocation5], %s4014_s13, %s4014_s13, %s4015_s14  }
   0x6   :  { %s4016_s15 = smov [#allocation2]   ;;  %s54_s19 = sshll.u32 %s4734_s6, 4  ;;  %s55_s19 = int_to_ptr.hbm [resolvable:$true] %s54_s19 }
   0x7   :  { %s26_s16 = sshll.u32 %s4016_s15, 4  ;;  %s67_s21 = sshll.u32 %s4735_s7, 4  ;;  %s27_s16 = int_to_ptr.vmem [resolvable:$true] %s26_s16  ;;  %s68_s21 = int_to_ptr.hbm [resolvable:$true] %s67_s21 }
   0x8   :  { %32 = dma.hbm_to_vmem [thread:$0]  %s25_s12, 8192, %s27_s16, [#allocation3], %s4014_s13, %s4014_s13, %s4015_s14  }
   0x9   :  { %s4017_s22 = smov [#allocation6]   ;;  %s4018_s2 = smov [#allocation7]  }
   0xa   :  { %s56_s23 = sshll.u32 %s4017_s22, 4  ;;  %s69_s24 = sshll.u32 %s4018_s2, 4  ;;  %s57_s23 = int_to_ptr.vmem [resolvable:$true] %s56_s23  ;;  %s70_s24 = int_to_ptr.vmem [resolvable:$true] %s69_s24 }
   0xb   :  { %62 = dma.hbm_to_vmem [thread:$0]  %s55_s19, 16384, %s57_s23, [#allocation5], %s4014_s13, %s4014_s13, %s4015_s14  }
   0xc   :  { %s4019_s25 = smov 64   ;;  %s4020_s26 = smov 4  }
   0xd   :  { %75 = dma.hbm_to_vmem [thread:$0]  %s68_s21, 2048, %s70_s24, [#allocation8], %s4019_s25, %s4019_s25, %s4020_s26  }
   0xe   :  { %4007 = dma.done.wait [#allocation3], 8192  }
   0xf   :  { %4008 = vsyncadd [#allocation3], 4294959104 }
  0x10   :  { %4009 = dma.done.wait [#allocation5], 16896  }
  0x11   :  { %4010 = vsyncadd [#allocation5], 4294950400 }
  0x12   :  { %4011 = dma.done.wait [#allocation8], 2048  }
  0x13   :  { %4012 = vsyncadd [#allocation8], 4294965248  ;;  %v101_v0 = vld [vmem:[%s4728_s0 + $0x40] sm:$0xff]  ;;  %v102_v1 = vld [vmem:[%s4728_s0 + $0x48] sm:$0xff]  ;;  %v4021_v28 = vmov 512.0  }
  0x14   :  { %v103_v2 = vld [vmem:[%s4728_s0 + $0x50] sm:$0xff]  ;;  %v131_v3 = vadd.f32 %v102_v1, %v101_v0  ;;  %v93_v4 = vld [vmem:[%s4728_s0] sm:$0xff]  ;;  %v94_v5 = vld [vmem:[%s4728_s0 + $0x8] sm:$0xff]  ;;  %3859 = vrcp.f32 %v4021_v28 }
  0x15   :  { %v104_v6 = vld [vmem:[%s4728_s0 + $0x58] sm:$0xff]  ;;  %v95_v7 = vld [vmem:[%s4728_s0 + $0x10] sm:$0xff]  ;;  %v121_v8 = vadd.f32 %v94_v5, %v93_v4  ;;  %v105_v9 = vld [vmem:[%s4728_s0 + $0x60] sm:$0xff] }
  0x16   :  { %v132_v10 = vadd.f32 %v131_v3, %v103_v2  ;;  %v96_v11 = vld [vmem:[%s4728_s0 + $0x18] sm:$0xff]  ;;  %v106_v12 = vld [vmem:[%s4728_s0 + $0x68] sm:$0xff]  ;;  %v107_v14 = vld [vmem:[%s4728_s0 + $0x70] sm:$0xff] }
  0x17   :  { %v122_v13 = vadd.f32 %v121_v8, %v95_v7  ;;  %v136_v15 = vadd.f32 %v106_v12, %v105_v9  ;;  %v97_v16 = vld [vmem:[%s4728_s0 + $0x20] sm:$0xff]  ;;  %v98_v17 = vld [vmem:[%s4728_s0 + $0x28] sm:$0xff]  ;;  %v99_v19 = vld [vmem:[%s4728_s0 + $0x30] sm:$0xff] }
  0x18   :  { %v133_v18 = vadd.f32 %v132_v10, %v104_v6  ;;  %v126_v20 = vadd.f32 %v98_v17, %v97_v16  ;;  %v108_v23 = vld [vmem:[%s4728_s0 + $0x78] sm:$0xff]  ;;  %v2814_v28 = vld [vmem:[#allocation2 + $0x170] sm:$0xf] }
  0x19   :  { %v123_v21 = vadd.f32 %v122_v13, %v96_v11  ;;  %v137_v22 = vadd.f32 %v136_v15, %v107_v14  ;;  %v100_v25 = vld [vmem:[%s4728_s0 + $0x38] sm:$0xff] }
  0x1a   :  { %134 = vadd.xlane.f32.xlu1 %v133_v18  ;;  %v127_v24 = vadd.f32 %v126_v20, %v99_v19  ;;  %v3860_v29 = vpop.eup %3859 }
  0x1b   :  { %124 = vadd.xlane.f32.xlu0 %v123_v21  ;;  %v138_v26 = vadd.f32 %v137_v22, %v108_v23  ;;  %v142_v30 = vmul.f32 512.0, %v3860_v29  ;;  %vm146_vm0 = vweird.f32 %v3860_v29 }
  0x1c   :  { %v128_v27 = vadd.f32 %v127_v24, %v100_v25  ;;  %v3621_v24 = vld [vmem:[#allocation2 + $0x74] sm:$0xf0] }
  0x1d   :  { %v143_v31 = vsub.f32 1.0, %v142_v30 }
  0x1f   :  { %v144_v32 = vmul.f32 %v3860_v29, %v143_v31 }
  0x21   :  { %v145_v33 = vadd.f32 %v3860_v29, %v144_v32  ;;  %v2878_v32 = vld [vmem:[#allocation2 + $0x1f0] sm:$0xf] }
  0x22   :  { %139 = vadd.xlane.f32.xlu1 %v138_v26 }
  0x23   :  { %129 = vadd.xlane.f32.xlu0 %v128_v27  ;;  %v4128_v34 = vsel %vm146_vm0, %v3860_v29, %v145_v33  ;;  %v3637_v27 = vld [vmem:[#allocation2 + $0xf4] sm:$0xf0] }
  0x24   :  { %v3653_v29 = vld [vmem:[#allocation2 + $0x174] sm:$0xf0] }
  0x25   :  { %v2815_v31 = vor.u32 %v3653_v29, %v2814_v28  ;;  %v3669_v33 = vld [vmem:[#allocation2 + $0x1f4] sm:$0xf0]  ;;  %v2782_v29 = vld [vmem:[#allocation2 + $0x130] sm:$0xf] }
  0x26   :  { %v3629_v28 = vld [vmem:[#allocation2 + $0xb4] sm:$0xf0] }
  0x27   :  { %753 = vmatpush.bf16.msra.mxu2 %v2815_v31 }
  0x8d   :  { %v135_v35 = vpop.xlane.xlu1 %134 }
  0x8e   :  { %v150_v36 = vmul.f32 %v4128_v34, %v135_v35  ;;  %v125_v37 = vpop.xlane.xlu0 %124  ;;  %v2879_v35 = vor.u32 %v3669_v33, %v2878_v32  ;;  %v2846_v33 = vld [vmem:[#allocation2 + $0x1b0] sm:$0xf] }
  0x8f   :  { %v148_v38 = vmul.f32 %v4128_v34, %v125_v37  ;;  %v3619_v37 = vld [vmem:[#allocation2 + $0x64] sm:$0xf0] }
  0x90   :  { %v4132_v39 = vsub.f32 %v101_v0, %v150_v36  ;;  %v4134_v40 = vsub.f32 %v102_v1, %v150_v36  ;;  %v4136_v41 = vsub.f32 %v103_v2, %v150_v36  ;;  %v4138_v42 = vsub.f32 %v104_v6, %v150_v36  ;;  %v2678_v36 = vld [vmem:[#allocation2 + $0x60] sm:$0xf]  ;;  %772 = vmatpush.bf16.msra.mxu3 %v2879_v35  ;;  %v3661_v35 = vld [vmem:[#allocation2 + $0x1b4] sm:$0xf0] }
  0x91   :  { %v4140_v43 = vsub.f32 %v93_v4, %v148_v38  ;;  %v4142_v44 = vsub.f32 %v94_v5, %v148_v38  ;;  %v4144_v45 = vsub.f32 %v95_v7, %v148_v38  ;;  %v4152_v49 = vsub.f32 %v96_v11, %v148_v38  ;;  %v2742_v38 = vld [vmem:[#allocation2 + $0xe0] sm:$0xf] }
  0x92   :  { %v176_v46 = vmul.f32 %v4132_v39, %v4132_v39  ;;  %v177_v47 = vmul.f32 %v4134_v40, %v4134_v40  ;;  %v178_v48 = vmul.f32 %v4136_v41, %v4136_v41  ;;  %v179_v52 = vmul.f32 %v4138_v42, %v4138_v42 }
  0x93   :  { %v168_v50 = vmul.f32 %v4140_v43, %v4140_v43  ;;  %v169_v51 = vmul.f32 %v4142_v44, %v4142_v44  ;;  %v170_v55 = vmul.f32 %v4144_v45, %v4144_v45  ;;  %v171_v61 = vmul.f32 %v4152_v49, %v4152_v49 }
  0x94   :  { %v194_v53 = vadd.f32 %v177_v47, %v176_v46  ;;  %v2679_v46 = vor.u32 %v3619_v37, %v2678_v36  ;;  %v3635_v47 = vld [vmem:[#allocation2 + $0xe4] sm:$0xf0]  ;;  %v2847_v36 = vor.u32 %v3661_v35, %v2846_v33  ;;  %v2646_v37 = vld [vmem:[#allocation2 + $0x20] sm:$0xf]  ;;  %v2688_v33 = vld [vmem:[#allocation2 + $0x78] sm:$0xf0] }
  0x95   :  { %v140_v54 = vpop.xlane.xlu1 %139  ;;  %v184_v56 = vadd.f32 %v169_v51, %v168_v50  ;;  %v3651_v50 = vld [vmem:[#allocation2 + $0x164] sm:$0xf0]  ;;  %v2743_v51 = vor.u32 %v3635_v47, %v2742_v38  ;;  %v3636_v35 = vld [vmem:[#allocation2 + $0xf4] sm:$0xf] }
  0x96   :  { %v151_v57 = vmul.f32 %v4128_v34, %v140_v54  ;;  %v130_v58 = vpop.xlane.xlu0 %129  ;;  %v195_v59 = vadd.f32 %v194_v53, %v178_v48  ;;  %v2806_v48 = vld [vmem:[#allocation2 + $0x160] sm:$0xf]  ;;  %v3667_v54 = vld [vmem:[#allocation2 + $0x1e4] sm:$0xf0] }
  0x97   :  { %v149_v60 = vmul.f32 %v4128_v34, %v130_v58  ;;  %v185_v62 = vadd.f32 %v184_v56, %v170_v55  ;;  %v2870_v53 = vld [vmem:[#allocation2 + $0x1e0] sm:$0xf]  ;;  %v2670_v56 = vld [vmem:[#allocation2 + $0x50] sm:$0xf]  ;;  %v3611_v38 = vld [vmem:[#allocation2 + $0x24] sm:$0xf0] }
  0x98   :  { %v4166_v63 = vsub.f32 %v105_v9, %v151_v57  ;;  %v4168_v0 = vsub.f32 %v106_v12, %v151_v57  ;;  %v196_v1 = vadd.f32 %v195_v59, %v179_v52  ;;  %v4170_v2 = vsub.f32 %v107_v14, %v151_v57  ;;  %v2734_v58 = vld [vmem:[#allocation2 + $0xd0] sm:$0xf] }
  0x99   :  { %v4172_v3 = vsub.f32 %v97_v16, %v149_v60  ;;  %v4174_v4 = vsub.f32 %v98_v17, %v149_v60  ;;  %v186_v5 = vadd.f32 %v185_v62, %v171_v61  ;;  %v4176_v6 = vsub.f32 %v108_v23, %v151_v57  ;;  %v2686_v23 = vld [vmem:[#allocation2 + $0x70] sm:$0xf]  ;;  %v3617_v57 = vld [vmem:[#allocation2 + $0x54] sm:$0xf0] }
  0x9a   :  { %197 = vadd.xlane.f32.xlu0 %v196_v1  ;;  %v180_v7 = vmul.f32 %v4166_v63, %v4166_v63  ;;  %v181_v8 = vmul.f32 %v4168_v0, %v4168_v0  ;;  %v182_v9 = vmul.f32 %v4170_v2, %v4170_v2  ;;  %v4184_v10 = vsub.f32 %v99_v19, %v149_v60  ;;  %v2798_v61 = vld [vmem:[#allocation2 + $0x150] sm:$0xf]  ;;  %v3649_v62 = vld [vmem:[#allocation2 + $0x154] sm:$0xf0] }
  0x9b   :  { %187 = vadd.xlane.f32.xlu2 %v186_v5  ;;  %v4186_v11 = vsub.f32 %v100_v25, %v149_v60  ;;  %v172_v12 = vmul.f32 %v4172_v3, %v4172_v3  ;;  %v173_v13 = vmul.f32 %v4174_v4, %v4174_v4  ;;  %v183_v14 = vmul.f32 %v4176_v6, %v4176_v6  ;;  %v2750_v25 = vld [vmem:[#allocation2 + $0xf0] sm:$0xf]  ;;  %v3633_v60 = vld [vmem:[#allocation2 + $0xd4] sm:$0xf0] }
  0x9c   :  { %v199_v15 = vadd.f32 %v181_v8, %v180_v7  ;;  %v174_v16 = vmul.f32 %v4184_v10, %v4184_v10  ;;  %v2687_v26 = vor.u32 %v3621_v24, %v2686_v23  ;;  %v2751_v30 = vor.u32 %v3637_v27, %v2750_v25  ;;  %v2862_v7 = vld [vmem:[#allocation2 + $0x1d0] sm:$0xf]  ;;  %v3665_v8 = vld [vmem:[#allocation2 + $0x1d4] sm:$0xf0] }
  0x9d   :  { %v189_v17 = vadd.f32 %v173_v13, %v172_v12  ;;  %v175_v19 = vmul.f32 %v4186_v11, %v4186_v11  ;;  %v2807_v52 = vor.u32 %v3651_v50, %v2806_v48  ;;  %v2871_v55 = vor.u32 %v3667_v54, %v2870_v53  ;;  %v2662_v12 = vld [vmem:[#allocation2 + $0x40] sm:$0xf]  ;;  %v3615_v13 = vld [vmem:[#allocation2 + $0x44] sm:$0xf0]  ;;  %v2654_v24 = vld [vmem:[#allocation2 + $0x30] sm:$0xf] }
  0x9e   :  { %v200_v18 = vadd.f32 %v199_v15, %v182_v9  ;;  %715 = vmatpush.bf16.msra.mxu0 %v2687_v26  ;;  %734 = vmatpush.bf16.msra.mxu1 %v2751_v30  ;;  %v2671_v59 = vor.u32 %v3617_v57, %v2670_v56  ;;  %v2735_v1 = vor.u32 %v3633_v60, %v2734_v58  ;;  %v3613_v25 = vld [vmem:[#allocation2 + $0x34] sm:$0xf0]  ;;  %v2718_v26 = vld [vmem:[#allocation2 + $0xb0] sm:$0xf]  ;;  %v3627_v48 = vld [vmem:[#allocation2 + $0xa4] sm:$0xf0] }
  0x9f   :  { %v190_v20 = vadd.f32 %v189_v17, %v174_v16  ;;  %754 = vmatpush.bf16.msra.mxu2 %v2807_v52  ;;  %773 = vmatpush.bf16.msra.mxu3 %v2871_v55  ;;  %v2799_v5 = vor.u32 %v3649_v62, %v2798_v61  ;;  %v2863_v9 = vor.u32 %v3665_v8, %v2862_v7  ;;  %v3631_v16 = vld [vmem:[#allocation2 + $0xc4] sm:$0xf0]  ;;  %v2790_v17 = vld [vmem:[#allocation2 + $0x140] sm:$0xf]  ;;  %v3645_v30 = vld [vmem:[#allocation2 + $0x134] sm:$0xf0] }
  0xa0   :  { %v201_v21 = vadd.f32 %v200_v18, %v183_v14  ;;  %v2726_v14 = vld [vmem:[#allocation2 + $0xc0] sm:$0xf]  ;;  %v2663_v15 = vor.u32 %v3615_v13, %v2662_v12  ;;  %v3647_v18 = vld [vmem:[#allocation2 + $0x144] sm:$0xf0]  ;;  %v2655_v27 = vor.u32 %v3613_v25, %v2654_v24  ;;  %v2719_v31 = vor.u32 %v3629_v28, %v2718_v26  ;;  %v2638_v57 = vld [vmem:[#allocation2 + $0x10] sm:$0xf] }
  0xa1   :  { %v191_v22 = vadd.f32 %v190_v20, %v175_v19  ;;  %v2727_v19 = vor.u32 %v3631_v16, %v2726_v14  ;;  %v2791_v20 = vor.u32 %v3647_v18, %v2790_v17  ;;  %v2783_v32 = vor.u32 %v3645_v30, %v2782_v29  ;;  %v2774_v50 = vld [vmem:[#allocation2 + $0x120] sm:$0xf]  ;;  %v3659_v55 = vld [vmem:[#allocation2 + $0x1a4] sm:$0xf0]  ;;  %v3609_v58 = vld [vmem:[#allocation2 + $0x14] sm:$0xf0] }
  0xa2   :  { %202 = vadd.xlane.f32.xlu1 %v201_v21  ;;  %716 = vmatpush.bf16.msra.mxu0 %v2679_v46  ;;  %v2854_v21 = vld [vmem:[#allocation2 + $0x1c0] sm:$0xf]  ;;  %v2647_v47 = vor.u32 %v3611_v38, %v2646_v37  ;;  %v2639_v61 = vor.u32 %v3609_v58, %v2638_v57  ;;  %v3625_v62 = vld [vmem:[#allocation2 + $0x94] sm:$0xf0]  ;;  %v2830_v12 = vld [vmem:[#allocation2 + $0x190] sm:$0xf] }
  0xa3   :  { %192 = vadd.xlane.f32.xlu2 %v191_v22  ;;  %735 = vmatpush.bf16.msra.mxu1 %v2743_v51  ;;  %v3663_v22 = vld [vmem:[#allocation2 + $0x1c4] sm:$0xf0]  ;;  %v2710_v46 = vld [vmem:[#allocation2 + $0xa0] sm:$0xf]  ;;  %v3657_v13 = vld [vmem:[#allocation2 + $0x194] sm:$0xf0] }
  0xa4   :  { %755 = vmatpush.bf16.msra.mxu2 %v2799_v5  ;;  %774 = vmatpush.bf16.msra.mxu3 %v2863_v9  ;;  %v2855_v23 = vor.u32 %v3663_v22, %v2854_v21  ;;  %v3643_v51 = vld [vmem:[#allocation2 + $0x124] sm:$0xf0]  ;;  %v2711_v52 = vor.u32 %v3627_v48, %v2710_v46  ;;  %v2838_v54 = vld [vmem:[#allocation2 + $0x1a0] sm:$0xf]  ;;  %v3641_v5 = vld [vmem:[#allocation2 + $0x114] sm:$0xf0]  ;;  %v2831_v16 = vor.u32 %v3657_v13, %v2830_v12 }
  0xa5   :  { %v2775_v53 = vor.u32 %v3643_v51, %v2774_v50  ;;  %v2839_v56 = vor.u32 %v3659_v55, %v2838_v54  ;;  %v2630_v14 = vld [vmem:[#allocation2] sm:$0xf]  ;;  %v3607_v17 = vld [vmem:[#allocation2 + $0x4] sm:$0xf0]  ;;  %v2752_v46 = vld [vmem:[#allocation2 + $0xf8] sm:$0xf0] }
  0xa6   :  { %717 = vmatpush.bf16.msra.mxu0 %v2671_v59  ;;  %v2702_v59 = vld [vmem:[#allocation2 + $0x90] sm:$0xf]  ;;  %v2694_v18 = vld [vmem:[#allocation2 + $0x80] sm:$0xf]  ;;  %v2631_v21 = vor.u32 %v3607_v17, %v2630_v14  ;;  %v3655_v28 = vld [vmem:[#allocation2 + $0x184] sm:$0xf0]  ;;  %v2755_v51 = vor.u32 %v3636_v35, %v2752_v46 }
  0xa7   :  { %736 = vmatpush.bf16.msra.mxu1 %v2735_v1  ;;  %v2766_v1 = vld [vmem:[#allocation2 + $0x110] sm:$0xf]  ;;  %v2703_v8 = vor.u32 %v3625_v62, %v2702_v59  ;;  %v2758_v22 = vld [vmem:[#allocation2 + $0x100] sm:$0xf]  ;;  %v2816_v48 = vld [vmem:[#allocation2 + $0x178] sm:$0xf0] }
  0xa8   :  { %756 = vmatpush.bf16.msra.mxu2 %v2791_v20  ;;  %775 = vmatpush.bf16.msra.mxu3 %v2855_v23  ;;  %v2767_v9 = vor.u32 %v3641_v5, %v2766_v1  ;;  %v3639_v23 = vld [vmem:[#allocation2 + $0x104] sm:$0xf0]  ;;  %v2880_v54 = vld [vmem:[#allocation2 + $0x1f8] sm:$0xf0]  ;;  %v3618_v55 = vld [vmem:[#allocation2 + $0x64] sm:$0xf] }
  0xa9   :  { %v2759_v26 = vor.u32 %v3639_v23, %v2758_v22  ;;  %v2680_v58 = vld [vmem:[#allocation2 + $0x68] sm:$0xf0]  ;;  %v3634_v59 = vld [vmem:[#allocation2 + $0xe4] sm:$0xf]  ;;  %v3616_v13 = vld [vmem:[#allocation2 + $0x54] sm:$0xf] }
  0xaa   :  { %718 = vmatpush.bf16.msra.mxu0 %v2663_v15  ;;  %v2744_v62 = vld [vmem:[#allocation2 + $0xe8] sm:$0xf0]  ;;  %v3650_v1 = vld [vmem:[#allocation2 + $0x164] sm:$0xf]  ;;  %v2672_v17 = vld [vmem:[#allocation2 + $0x58] sm:$0xf0] }
  0xab   :  { %737 = vmatpush.bf16.msra.mxu1 %v2727_v19  ;;  %v3623_v19 = vld [vmem:[#allocation2 + $0x84] sm:$0xf0]  ;;  %v2872_v12 = vld [vmem:[#allocation2 + $0x1e8] sm:$0xf0]  ;;  %v3648_v22 = vld [vmem:[#allocation2 + $0x154] sm:$0xf] }
  0xac   :  { %757 = vmatpush.bf16.msra.mxu2 %v2783_v32  ;;  %776 = vmatpush.bf16.msra.mxu3 %v2847_v36  ;;  %v2695_v25 = vor.u32 %v3623_v19, %v2694_v18  ;;  %v3620_v32 = vld [vmem:[#allocation2 + $0x74] sm:$0xf]  ;;  %v2736_v19 = vld [vmem:[#allocation2 + $0xd8] sm:$0xf0]  ;;  %v2664_v35 = vld [vmem:[#allocation2 + $0x48] sm:$0xf0] }
  0xad   :  { %v2691_v38 = vor.u32 %v3620_v32, %v2688_v33  ;;  %v3632_v18 = vld [vmem:[#allocation2 + $0xd4] sm:$0xf]  ;;  %v2800_v23 = vld [vmem:[#allocation2 + $0x158] sm:$0xf0]  ;;  %v3614_v33 = vld [vmem:[#allocation2 + $0x44] sm:$0xf] }
  0xae   :  { %719 = vmatpush.bf16.msra.mxu0 %v2655_v27  ;;  %v2822_v27 = vld [vmem:[#allocation2 + $0x180] sm:$0xf]  ;;  %v3630_v46 = vld [vmem:[#allocation2 + $0xc4] sm:$0xf] }
  0xaf   :  { %738 = vmatpush.bf16.msra.mxu1 %v2719_v31  ;;  %v2823_v29 = vor.u32 %v3655_v28, %v2822_v27  ;;  %v2803_v27 = vor.u32 %v3648_v22, %v2800_v23  ;;  %v3664_v28 = vld [vmem:[#allocation2 + $0x1d4] sm:$0xf]  ;;  %v2720_v22 = vld [vmem:[#allocation2 + $0xb8] sm:$0xf0] }
  0xb0   :  { %758 = vmatpush.bf16.msra.mxu2 %v2775_v53  ;;  %777 = vmatpush.bf16.msra.mxu3 %v2839_v56  ;;  %v3668_v53 = vld [vmem:[#allocation2 + $0x1f4] sm:$0xf] }
  0xb1   :  { %v2883_v57 = vor.u32 %v3668_v53, %v2880_v54  ;;  %v3646_v53 = vld [vmem:[#allocation2 + $0x144] sm:$0xf]  ;;  %v2792_v54 = vld [vmem:[#allocation2 + $0x148] sm:$0xf0] }
  0xb2   :  { %720 = vmatpush.bf16.msra.mxu0 %v2647_v47  ;;  %v3652_v47 = vld [vmem:[#allocation2 + $0x174] sm:$0xf] }
  0xb3   :  { %739 = vmatpush.bf16.msra.mxu1 %v2711_v52  ;;  %v2819_v52 = vor.u32 %v3652_v47, %v2816_v48  ;;  %v2728_v47 = vld [vmem:[#allocation2 + $0xc8] sm:$0xf0] }
  0xb4   :  { %759 = vmatpush.bf16.msra.mxu2 %v2767_v9  ;;  %778 = vmatpush.bf16.msra.mxu3 %v2831_v16  ;;  %v2747_v9 = vor.u32 %v3634_v59, %v2744_v62  ;;  %v2624_v59 = vld [vmem:[%s4729_s1 + $0x1] ss:$8 sm:$0xf]  ;;  %v2856_v62 = vld [vmem:[#allocation2 + $0x1c8] sm:$0xf0] }
  0xb6   :  { %721 = vmatpush.bf16.msra.mxu0 %v2639_v61 }
  0xb7   :  { %740 = vmatpush.bf16.msra.mxu1 %v2703_v8  ;;  %v3666_v8 = vld [vmem:[#allocation2 + $0x1e4] sm:$0xf] }
  0xb8   :  { %760 = vmatpush.bf16.msra.mxu2 %v2759_v26  ;;  %779 = vmatpush.bf16.msra.mxu3 %v2823_v29  ;;  %v2875_v16 = vor.u32 %v3666_v8, %v2872_v12  ;;  %v2864_v29 = vld [vmem:[#allocation2 + $0x1d8] sm:$0xf0] }
  0xb9   :  { %v2867_v32 = vor.u32 %v3664_v28, %v2864_v29  ;;  %v3644_v29 = vld [vmem:[#allocation2 + $0x134] sm:$0xf] }
  0xba   :  { %722 = vmatpush.bf16.msra.mxu0 %v2631_v21  ;;  %v2739_v21 = vor.u32 %v3632_v18, %v2736_v19 }
  0xbb   :  { %741 = vmatpush.bf16.msra.mxu1 %v2695_v25 }
  0xbc   :  { %829 = vmatpush.bf16.msrb.mxu2 %v2819_v52  ;;  %848 = vmatpush.bf16.msrb.mxu3 %v2883_v57  ;;  %v2731_v52 = vor.u32 %v3630_v46, %v2728_v47 }
  0xbe   :  { %791 = vmatpush.bf16.msrb.mxu0 %v2691_v38  ;;  %v2667_v38 = vor.u32 %v3614_v33, %v2664_v35  ;;  %v4262_v33 = vperm.slane %v2624_v59, 3 }
  0xbf   :  { %810 = vmatpush.bf16.msrb.mxu1 %v2755_v51 }
  0xc0   :  { %849 = vmatpush.bf16.msrb.mxu3 %v2875_v16 }
  0xc3   :  { %811 = vmatpush.bf16.msrb.mxu1 %v2747_v9  ;;  %v4243_v9 = vperm.slane %v2624_v59, 0 }
  0xc4   :  { %850 = vmatpush.bf16.msrb.mxu3 %v2867_v32  ;;  %v2784_v32 = vld [vmem:[#allocation2 + $0x138] sm:$0xf0] }
  0xc7   :  { %812 = vmatpush.bf16.msrb.mxu1 %v2739_v21  ;;  %v3628_v21 = vld [vmem:[#allocation2 + $0xb4] sm:$0xf] }
  0xcb   :  { %813 = vmatpush.bf16.msrb.mxu1 %v2731_v52 }
 0x10d   :  { %v198_v60 = vpop.xlane.xlu0 %197 }
 0x10e   :  { %v188_v7 = vpop.xlane.xlu2 %187  ;;  %v206_v20 = vmul.f32 %v198_v60, %v4128_v34 }
 0x10f   :  { %v204_v15 = vmul.f32 %v188_v7, %v4128_v34  ;;  %v2808_v7 = vld [vmem:[#allocation2 + $0x168] sm:$0xf0] }
 0x110   :  { %v4203_v30 = vadd.f32 1e-05, %v206_v20  ;;  %v2675_v20 = vor.u32 %v3616_v13, %v2672_v17  ;;  %v4247_v13 = vperm.slane %v2624_v59, 1 }
 0x111   :  { %v4200_v24 = vadd.f32 1e-05, %v204_v15  ;;  %v2811_v15 = vor.u32 %v3650_v1, %v2808_v7 }
 0x112   :  { %vm238_vm9 = vweird.f32 %v4203_v30 }
 0x113   :  { %3861 = vrsqrt.f32 %v4200_v24  ;;  %830 = vmatpush.bf16.msrb.mxu2 %v2811_v15  ;;  %vm218_vm2 = vweird.f32 %v4200_v24 }
 0x114   :  { %3863 = vrsqrt.f32 %v4203_v30 }
 0x115   :  { %v203_v31 = vpop.xlane.xlu1 %202 }
 0x116   :  { %v207_v36 = vmul.f32 %v203_v31, %v4128_v34  ;;  %v193_v37 = vpop.xlane.xlu2 %192  ;;  %v109_v31 = vld [vmem:[%s4729_s1] ss:$8 sm:$0xf] }
 0x117   :  { %v205_v50 = vmul.f32 %v193_v37, %v4128_v34  ;;  %v2683_v34 = vor.u32 %v3618_v55, %v2680_v58  ;;  %v3662_v55 = vld [vmem:[#allocation2 + $0x1c4] sm:$0xf]  ;;  %831 = vmatpush.bf16.msrb.mxu2 %v2803_v27  ;;  %v4245_v12 = vperm.slane %v109_v31, 1  ;;  %v4252_v18 = vperm.slane %v109_v31, 3 }
 0x118   :  { %v4208_v56 = vadd.f32 1e-05, %v207_v36 }
 0x119   :  { %v4210_v60 = vpop.eup %3861  ;;  %v4212_v61 = vadd.f32 1e-05, %v205_v50  ;;  %792 = vmatpush.bf16.msrb.mxu0 %v2683_v34  ;;  %v2795_v34 = vor.u32 %v3646_v53, %v2792_v54 }
 0x11a   :  { %v213_v5 = vmul.f32 %v4210_v60, %v4200_v24  ;;  %3865 = vrsqrt.f32 %v4208_v56  ;;  %v4219_v25 = vpop.eup %3863  ;;  %vm219_vm1 = vweird.f32 %v4210_v60  ;;  %v4241_v24 = vperm.slane %v109_v31, 0 }
 0x11b   :  { %3867 = vrsqrt.f32 %v4212_v61  ;;  %v233_v50 = vmul.f32 %v4219_v25, %v4203_v30  ;;  %vm220_vm3 = vmor %vm218_vm2, %vm219_vm1  ;;  %832 = vmatpush.bf16.msrb.mxu2 %v2795_v34  ;;  %vm248_vm5 = vweird.f32 %v4208_v56  ;;  %vm228_vm6 = vweird.f32 %v4212_v61 }
 0x11c   :  { %v214_v14 = vmul.f32 %v4210_v60, %v213_v5  ;;  %v2859_v5 = vor.u32 %v3662_v55, %v2856_v62  ;;  %vm239_vm10 = vweird.f32 %v4219_v25  ;;  %v3660_v62 = vld [vmem:[#allocation2 + $0x1b4] sm:$0xf] }
 0x11d   :  { %793 = vmatpush.bf16.msrb.mxu0 %v2675_v20  ;;  %v234_v15 = vmul.f32 %v4219_v25, %v233_v50  ;;  %v2656_v20 = vld [vmem:[#allocation2 + $0x38] sm:$0xf0]  ;;  %vm4299_vm12 = vmor %vm238_vm9, %vm239_vm10  ;;  %vm1054_vm10 = vcmask 261120  }
 0x11e   :  { %v215_v26 = vmul.f32 0.5, %v214_v14  ;;  %v4249_v14 = vperm.slane %v109_v31, 2  ;;  %851 = vmatpush.bf16.msrb.mxu3 %v2859_v5  ;;  %v4260_v31 = vperm.slane %v2624_v59, 2 }
 0x120   :  { %v4224_v36 = vpop.eup %3865  ;;  %v216_v37 = vsub.f32 1.5, %v215_v26 }
 0x121   :  { %v3868_v48 = vpop.eup %3867  ;;  %v243_v51 = vmul.f32 %v4224_v36, %v4208_v56  ;;  %794 = vmatpush.bf16.msrb.mxu0 %v2667_v38  ;;  %vm249_vm7 = vweird.f32 %v4224_v36  ;;  %v2787_v38 = vor.u32 %v3644_v29, %v2784_v32  ;;  %v3610_v56 = vld [vmem:[#allocation2 + $0x24] sm:$0xf]  ;;  %v2840_v32 = vld [vmem:[#allocation2 + $0x1a8] sm:$0xf0] }
 0x122   :  { %v217_v57 = vmul.f32 %v4210_v60, %v216_v37  ;;  %v223_v58 = vmul.f32 %v3868_v48, %v4212_v61  ;;  %vm229_vm4 = vweird.f32 %v3868_v48  ;;  %vm250_vm11 = vmor %vm248_vm5, %vm249_vm7 }
 0x123   :  { %v244_v1 = vmul.f32 %v4224_v36, %v243_v51  ;;  %vm230_vm8 = vmor %vm228_vm6, %vm229_vm4  ;;  %833 = vmatpush.bf16.msrb.mxu2 %v2787_v38  ;;  %v2704_v38 = vld [vmem:[#allocation2 + $0x98] sm:$0xf0] }
 0x124   :  { %v221_v7 = vsel %vm220_vm3, %v4210_v60, %v217_v57  ;;  %v224_v8 = vmul.f32 %v3868_v48, %v223_v58  ;;  %v3612_v60 = vld [vmem:[#allocation2 + $0x34] sm:$0xf] }
 0x125   :  { %v245_v16 = vmul.f32 0.5, %v244_v1  ;;  %v252_v19 = vmul.f32 %v221_v7, %v4140_v43  ;;  %v253_v26 = vmul.f32 %v221_v7, %v4142_v44  ;;  %v254_v27 = vmul.f32 %v221_v7, %v4144_v45  ;;  %v2848_v1 = vld [vmem:[#allocation2 + $0x1b8] sm:$0xf0] }
 0x126   :  { %v225_v17 = vmul.f32 0.5, %v224_v8  ;;  %v255_v28 = vmul.f32 %v221_v7, %v4152_v49  ;;  %v235_v43 = vmul.f32 0.5, %v234_v15  ;;  %v2659_v45 = vor.u32 %v3612_v60, %v2656_v20  ;;  %v2712_v20 = vld [vmem:[#allocation2 + $0xa8] sm:$0xf0] }
 0x127   :  { %v246_v35 = vsub.f32 1.5, %v245_v16  ;;  %v277_v44 = vmul.f32 %v4241_v24, %v252_v19  ;;  %v2723_v49 = vor.u32 %v3628_v21, %v2720_v22  ;;  %v278_v47 = vmul.f32 %v4245_v12, %v253_v26  ;;  %v2648_v16 = vld [vmem:[#allocation2 + $0x28] sm:$0xf0]  ;;  %v3642_v21 = vld [vmem:[#allocation2 + $0x124] sm:$0xf] }
 0x128   :  { %v226_v23 = vsub.f32 1.5, %v225_v17  ;;  %v279_v61 = vmul.f32 %v4249_v14, %v254_v27  ;;  %v280_v50 = vmul.f32 %v4252_v18, %v255_v28  ;;  %795 = vmatpush.bf16.msrb.mxu0 %v2659_v45  ;;  %v236_v55 = vsub.f32 1.5, %v235_v43  ;;  %v3626_v17 = vld [vmem:[#allocation2 + $0xa4] sm:$0xf]  ;;  %v2776_v22 = vld [vmem:[#allocation2 + $0x128] sm:$0xf0] }
 0x129   :  { %814 = vmatpush.bf16.msrb.mxu1 %v2723_v49  ;;  %v2851_v43 = vor.u32 %v3660_v62, %v2848_v1  ;;  %v3624_v45 = vld [vmem:[#allocation2 + $0x94] sm:$0xf]  ;;  %v2715_v30 = vor.u32 %v3626_v17, %v2712_v20  ;;  %v2779_v49 = vor.u32 %v3642_v21, %v2776_v22 }
 0x12a   :  { %v227_v37 = vmul.f32 %v3868_v48, %v226_v23  ;;  %v304_v59 = vadd.f32 %v4260_v31, %v279_v61  ;;  %v305_v34 = vadd.f32 %v4262_v33, %v280_v50  ;;  %v237_v60 = vmul.f32 %v4219_v25, %v236_v55  ;;  %v3656_v55 = vld [vmem:[#allocation2 + $0x194] sm:$0xf] }
 0x12b   :  { %852 = vmatpush.bf16.msrb.mxu3 %v2851_v43  ;;  %834 = vmatpush.bf16.msrb.mxu2 %v2779_v49 }
 0x12c   :  { %v231_v46 = vsel %vm230_vm8, %v3868_v48, %v227_v37  ;;  %v247_v48 = vmul.f32 %v4224_v36, %v246_v35  ;;  %v2651_v35 = vor.u32 %v3610_v56, %v2648_v16  ;;  %v3608_v37 = vld [vmem:[#allocation2 + $0x14] sm:$0xf]  ;;  %v241_v61 = vsel %vm4299_vm12, %v4219_v25, %v237_v60  ;;  %v3654_v56 = vld [vmem:[#allocation2 + $0x184] sm:$0xf]  ;;  %v2824_v16 = vld [vmem:[#allocation2 + $0x188] sm:$0xf0] }
 0x12d   :  { %v256_v51 = vmul.f32 %v231_v46, %v4172_v3  ;;  %v257_v52 = vmul.f32 %v231_v46, %v4174_v4  ;;  %v258_v53 = vmul.f32 %v231_v46, %v4184_v10  ;;  %v259_v54 = vmul.f32 %v231_v46, %v4186_v11  ;;  %v3640_v46 = vld [vmem:[#allocation2 + $0x114] sm:$0xf]  ;;  %815 = vmatpush.bf16.msrb.mxu1 %v2715_v30 }
 0x12e   :  { %v302_v10 = vadd.f32 %v4243_v9, %v277_v44  ;;  %v303_v11 = vadd.f32 %v4247_v13, %v278_v47  ;;  %v251_v19 = vsel %vm250_vm11, %v4224_v36, %v247_v48  ;;  %v3658_v36 = vld [vmem:[#allocation2 + $0x1a4] sm:$0xf]  ;;  %v2640_v44 = vld [vmem:[#allocation2 + $0x18] sm:$0xf0]  ;;  %796 = vmatpush.bf16.msrb.mxu0 %v2651_v35  ;;  %v2707_v25 = vor.u32 %v3624_v45, %v2704_v38 }
 0x12f   :  { %v281_v57 = vmul.f32 %v4241_v24, %v256_v51  ;;  %v282_v58 = vmul.f32 %v4245_v12, %v257_v52  ;;  %v283_v3 = vmul.f32 %v4249_v14, %v258_v53  ;;  %v284_v4 = vmul.f32 %v4252_v18, %v259_v54  ;;  %v2768_v47 = vld [vmem:[#allocation2 + $0x118] sm:$0xf0] }
 0x130   :  { %v264_v50 = vmul.f32 %v251_v19, %v4166_v63  ;;  %v265_v51 = vmul.f32 %v251_v19, %v4168_v0  ;;  %v266_v52 = vmul.f32 %v251_v19, %v4170_v2  ;;  %v2843_v53 = vor.u32 %v3658_v36, %v2840_v32  ;;  %v2832_v48 = vld [vmem:[#allocation2 + $0x198] sm:$0xf0]  ;;  %v2696_v2 = vld [vmem:[#allocation2 + $0x88] sm:$0xf0] }
 0x131   :  { %v306_v5 = vadd.f32 %v4243_v9, %v281_v57  ;;  %v307_v7 = vadd.f32 %v4247_v13, %v282_v58  ;;  %v308_v8 = vadd.f32 %v4260_v31, %v283_v3  ;;  %v309_v15 = vadd.f32 %v4262_v33, %v284_v4  ;;  %v3606_v3 = vld [vmem:[#allocation2 + $0x4] sm:$0xf]  ;;  %v2632_v4 = vld [vmem:[#allocation2 + $0x8] sm:$0xf0]  ;;  %816 = vmatpush.bf16.msrb.mxu1 %v2707_v25 }
 0x132   :  { %v2643_v54 = vor.u32 %v3608_v37, %v2640_v44  ;;  %v267_v57 = vmul.f32 %v251_v19, %v4176_v6  ;;  %v2771_v58 = vor.u32 %v3640_v46, %v2768_v47  ;;  %v260_v63 = vmul.f32 %v241_v61, %v4132_v39  ;;  %853 = vmatpush.bf16.msrb.mxu3 %v2843_v53 }
 0x133   :  { %v4303_v26 = vpack.c.bf16 %v306_v5, %v302_v10  ;;  %v4305_v27 = vpack.c.bf16 %v307_v7, %v303_v11  ;;  %v4307_v28 = vpack.c.bf16 %v308_v8, %v304_v59  ;;  %v4309_v29 = vpack.c.bf16 %v309_v15, %v305_v34  ;;  %v3622_v10 = vld [vmem:[#allocation2 + $0x84] sm:$0xf]  ;;  %v2760_v59 = vld [vmem:[#allocation2 + $0x108] sm:$0xf0] }
 0x134   :  { %v261_v0 = vmul.f32 %v241_v61, %v4134_v40  ;;  %v3638_v11 = vld [vmem:[#allocation2 + $0x104] sm:$0xf]  ;;  %v289_v34 = vmul.f32 %v4241_v24, %v264_v50  ;;  %v290_v62 = vmul.f32 %v4245_v12, %v265_v51  ;;  %v262_v6 = vmul.f32 %v241_v61, %v4136_v41  ;;  %797 = vmatpush.bf16.msrb.mxu0 %v2643_v54 }
 0x135   :  { %723 = vmatmul.bf16.vlgmr.msra.gmra.mxu0 %v4303_v26  ;;  %742 = vmatmul.bf16.vlgmr.msra.gmra.mxu1 %v4305_v27  ;;  %v263_v1 = vmul.f32 %v241_v61, %v4138_v42  ;;  %v291_v5 = vmul.f32 %v4249_v14, %v266_v52  ;;  %v2835_v7 = vor.u32 %v3656_v55, %v2832_v48 }
 0x136   :  { %761 = vmatmul.bf16.vlgmr.msra.gmra.mxu2 %v4307_v28  ;;  %780 = vmatmul.bf16.vlgmr.msra.gmra.mxu3 %v4309_v29  ;;  %v2635_v8 = vor.u32 %v3606_v3, %v2632_v4  ;;  %v292_v39 = vmul.f32 %v4252_v18, %v267_v57  ;;  %v2699_v40 = vor.u32 %v3622_v10, %v2696_v2 }
 0x137   :  { %835 = vmatpush.bf16.msrb.mxu2 %v2771_v58  ;;  %v2763_v15 = vor.u32 %v3638_v11, %v2760_v59  ;;  %v285_v17 = vmul.f32 %v4241_v24, %v260_v63  ;;  %v286_v41 = vmul.f32 %v4245_v12, %v261_v0  ;;  %v287_v42 = vmul.f32 %v4249_v14, %v262_v6 }
 0x138   :  { %v288_v60 = vmul.f32 %v4252_v18, %v263_v1  ;;  %v314_v19 = vadd.f32 %v4243_v9, %v289_v34  ;;  %v315_v20 = vadd.f32 %v4247_v13, %v290_v62  ;;  %854 = vmatpush.bf16.msrb.mxu3 %v2835_v7  ;;  %798 = vmatpush.bf16.msrb.mxu0 %v2635_v8 }
 0x139   :  { %v2827_v21 = vor.u32 %v3654_v56, %v2824_v16  ;;  %v316_v22 = vadd.f32 %v4260_v31, %v291_v5  ;;  %v317_v23 = vadd.f32 %v4262_v33, %v292_v39  ;;  %817 = vmatpush.bf16.msrb.mxu1 %v2699_v40  ;;  %v310_v24 = vadd.f32 %v4243_v9, %v285_v17  ;;  %v2625_v9 = vld [vmem:[%s4729_s1 + $0x2] ss:$8 sm:$0x3] }
 0x13a   :  { %v311_v12 = vadd.f32 %v4247_v13, %v286_v41  ;;  %v312_v14 = vadd.f32 %v4260_v31, %v287_v42  ;;  %v313_v18 = vadd.f32 %v4262_v33, %v288_v60  ;;  %v391_v13 = vperm.slane %v2625_v9, 0 }
 0x13b   :  { %836 = vmatpush.bf16.msrb.mxu2 %v2763_v15  ;;  %v322_v36 = vpack.c.bf16 %v314_v19, %v310_v24  ;;  %v392_v63 = vperm.slane %v2625_v9, 1 }
 0x13c   :  { %v323_v32 = vpack.c.bf16 %v315_v20, %v311_v12  ;;  %855 = vmatpush.bf16.msrb.mxu3 %v2827_v21  ;;  %v324_v43 = vpack.c.bf16 %v316_v22, %v312_v14  ;;  %v325_v35 = vpack.c.bf16 %v317_v23, %v313_v18 }
 0x145   :  { %728 = vmatmul.bf16.gmra.mxu0 %v322_v36  ;;  %747 = vmatmul.bf16.gmra.mxu1 %v323_v32 }
 0x146   :  { %766 = vmatmul.bf16.gmra.mxu2 %v324_v43  ;;  %785 = vmatmul.bf16.gmra.mxu3 %v325_v35 }
 0x155   :  { %799 = vmatmul.bf16.vlgmr.msrb.gmra.mxu0 %v4303_v26  ;;  %818 = vmatmul.bf16.vlgmr.msrb.gmra.mxu1 %v4305_v27 }
 0x156   :  { %837 = vmatmul.bf16.vlgmr.msrb.gmra.mxu2 %v4307_v28  ;;  %856 = vmatmul.bf16.vlgmr.msrb.gmra.mxu3 %v4309_v29 }
 0x165   :  { %804 = vmatmul.bf16.gmra.mxu0 %v322_v36  ;;  %823 = vmatmul.bf16.gmra.mxu1 %v323_v32 }
 0x166   :  { %842 = vmatmul.bf16.gmra.mxu2 %v324_v43  ;;  %861 = vmatmul.bf16.gmra.mxu3 %v325_v35 }
 0x1b2   :  { %v724_v31 = vpop.f32.mrf.mxu0  ;;  %v743_v33 = vpop.f32.mrf.mxu1 }
 0x1b3   :  { %v725_v37 = vadd.f32 %v724_v31, %v391_v13 }
 0x1b5   :  { %v744_v44 = vadd.f32 %v743_v33, %v725_v37 }
 0x1b9   :  { %v762_v26 = vpop.f32.mrf.mxu2  ;;  %v781_v45 = vpop.f32.mrf.mxu3 }
 0x1ba   :  { %v763_v27 = vadd.f32 %v762_v26, %v744_v44  ;;  %v726_v30 = vpop.f32.mrf.mxu0  ;;  %v745_v28 = vpop.f32.mrf.mxu1 }
 0x1bb   :  { %v727_v29 = vadd.f32 %v726_v30, %v391_v13 }
 0x1bc   :  { %v4349_v49 = vadd.f32 %v781_v45, %v763_v27 }
 0x1bd   :  { %v746_v38 = vadd.f32 %v745_v28, %v727_v29 }
 0x1c1   :  { %v764_v46 = vpop.f32.mrf.mxu2  ;;  %v783_v47 = vpop.f32.mrf.mxu3 }
 0x1c2   :  { %v765_v61 = vadd.f32 %v764_v46, %v746_v38  ;;  %v729_v50 = vpop.f32.mrf.mxu0  ;;  %v748_v51 = vpop.f32.mrf.mxu1 }
 0x1c3   :  { %v730_v52 = vadd.f32 %v729_v50, %v391_v13 }
 0x1c4   :  { %v4351_v53 = vadd.f32 %v783_v47, %v765_v61 }
 0x1c5   :  { %v749_v54 = vadd.f32 %v748_v51, %v730_v52 }
 0x1c9   :  { %v767_v55 = vpop.f32.mrf.mxu2  ;;  %v786_v48 = vpop.f32.mrf.mxu3 }
 0x1ca   :  { %v768_v57 = vadd.f32 %v767_v55, %v749_v54  ;;  %v731_v25 = vpop.f32.mrf.mxu0  ;;  %v750_v58 = vpop.f32.mrf.mxu1 }
 0x1cb   :  { %v732_v3 = vadd.f32 %v731_v25, %v391_v13 }
 0x1cc   :  { %v4353_v4 = vadd.f32 %v786_v48, %v768_v57 }
 0x1cd   :  { %v751_v10 = vadd.f32 %v750_v58, %v732_v3 }
 0x1d1   :  { %v769_v0 = vpop.f32.mrf.mxu2  ;;  %v788_v2 = vpop.f32.mrf.mxu3 }
 0x1d2   :  { %v770_v11 = vadd.f32 %v769_v0, %v751_v10  ;;  %v800_v59 = vpop.f32.mrf.mxu0  ;;  %v819_v34 = vpop.f32.mrf.mxu1 }
 0x1d3   :  { %v801_v6 = vadd.f32 %v800_v59, %v392_v63 }
 0x1d4   :  { %v4355_v62 = vadd.f32 %v788_v2, %v770_v11 }
 0x1d5   :  { %v820_v1 = vadd.f32 %v819_v34, %v801_v6 }
 0x1d9   :  { %v838_v5 = vpop.f32.mrf.mxu2  ;;  %v857_v7 = vpop.f32.mrf.mxu3 }
 0x1da   :  { %v839_v8 = vadd.f32 %v838_v5, %v820_v1  ;;  %v802_v39 = vpop.f32.mrf.mxu0  ;;  %v821_v40 = vpop.f32.mrf.mxu1 }
 0x1db   :  { %v803_v56 = vadd.f32 %v802_v39, %v392_v63 }
 0x1dc   :  { %v858_v15 = vadd.f32 %v857_v7, %v839_v8 }
 0x1dd   :  { %v822_v41 = vadd.f32 %v821_v40, %v803_v56  ;;  %v4022_v40 = vmov 128.0  }
 0x1de   :  { %v868_v16 = vmul.f32 %v858_v15, %v858_v15 }
 0x1e0   :  { %v876_v17 = vmul.f32 %v868_v16, %v858_v15 }
 0x1e1   :  { %v840_v42 = vpop.f32.mrf.mxu2  ;;  %v859_v60 = vpop.f32.mrf.mxu3 }
 0x1e2   :  { %v841_v19 = vadd.f32 %v840_v42, %v822_v41  ;;  %v805_v20 = vpop.f32.mrf.mxu0  ;;  %v884_v21 = vmul.f32 0.044715, %v876_v17  ;;  %v824_v12 = vpop.f32.mrf.mxu1 }
 0x1e3   :  { %v806_v23 = vadd.f32 %v805_v20, %v392_v63 }
 0x1e4   :  { %v860_v22 = vadd.f32 %v859_v60, %v841_v19  ;;  %v892_v24 = vadd.f32 %v884_v21, %v858_v15 }
 0x1e5   :  { %v825_v36 = vadd.f32 %v824_v12, %v806_v23 }
 0x1e6   :  { %v870_v14 = vmul.f32 %v860_v22, %v860_v22  ;;  %v900_v18 = vmul.f32 0.7978846, %v892_v24 }
 0x1e8   :  { %3869 = vtanh.f32 %v900_v18  ;;  %v878_v35 = vmul.f32 %v870_v14, %v860_v22 }
 0x1e9   :  { %v843_v32 = vpop.f32.mrf.mxu2  ;;  %v862_v43 = vpop.f32.mrf.mxu3 }
 0x1ea   :  { %v844_v9 = vadd.f32 %v843_v32, %v825_v36  ;;  %v807_v13 = vpop.f32.mrf.mxu0  ;;  %v886_v26 = vmul.f32 0.044715, %v878_v35  ;;  %v826_v45 = vpop.f32.mrf.mxu1 }
 0x1eb   :  { %v808_v33 = vadd.f32 %v807_v13, %v392_v63 }
 0x1ec   :  { %v863_v31 = vadd.f32 %v862_v43, %v844_v9  ;;  %v894_v61 = vadd.f32 %v886_v26, %v860_v22 }
 0x1ed   :  { %v827_v28 = vadd.f32 %v826_v45, %v808_v33 }
 0x1ee   :  { %v3870_v37 = vpop.eup %3869  ;;  %v872_v44 = vmul.f32 %v863_v31, %v863_v31  ;;  %v902_v57 = vmul.f32 0.7978846, %v894_v61 }
 0x1ef   :  { %v916_v27 = vadd.f32 1.0, %v3870_v37 }
 0x1f0   :  { %v880_v30 = vmul.f32 %v872_v44, %v863_v31 }
 0x1f1   :  { %v845_v29 = vpop.f32.mrf.mxu2  ;;  %v924_v38 = vmul.f32 0.5, %v916_v27  ;;  %v864_v50 = vpop.f32.mrf.mxu3 }
 0x1f2   :  { %v846_v46 = vadd.f32 %v845_v29, %v827_v28  ;;  %v888_v47 = vmul.f32 0.044715, %v880_v30 }
 0x1f3   :  { %v932_v51 = vmul.f32 %v924_v38, %v858_v15 }
 0x1f4   :  { %v865_v52 = vadd.f32 %v864_v50, %v846_v46  ;;  %v896_v54 = vadd.f32 %v888_v47, %v863_v31 }
 0x1f5   :  { %939 = vadd.xlane.f32.xlu1 %v932_v51 }
 0x1f6   :  { %v874_v55 = vmul.f32 %v865_v52, %v865_v52  ;;  %v904_v48 = vmul.f32 0.7978846, %v896_v54 }
 0x1f8   :  { %v882_v25 = vmul.f32 %v874_v55, %v865_v52  ;;  %3871 = vtanh.f32 %v904_v48 }
 0x1f9   :  { %3873 = vtanh.f32 %v902_v57 }
 0x1fa   :  { %v890_v58 = vmul.f32 0.044715, %v882_v25 }
 0x1fc   :  { %v898_v3 = vadd.f32 %v890_v58, %v865_v52 }
 0x1fe   :  { %v3872_v10 = vpop.eup %3871  ;;  %v906_v63 = vmul.f32 0.7978846, %v898_v3 }
 0x1ff   :  { %v920_v0 = vadd.f32 1.0, %v3872_v10  ;;  %v3874_v2 = vpop.eup %3873 }
 0x200   :  { %3875 = vtanh.f32 %v906_v63  ;;  %v918_v34 = vadd.f32 1.0, %v3874_v2 }
 0x201   :  { %v928_v11 = vmul.f32 0.5, %v920_v0  ;;  %3877 = vrcp.f32 %v4022_v40 }
 0x202   :  { %v926_v5 = vmul.f32 0.5, %v918_v34 }
 0x203   :  { %v936_v59 = vmul.f32 %v928_v11, %v863_v31 }
 0x204   :  { %v934_v39 = vmul.f32 %v926_v5, %v860_v22 }
 0x205   :  { %943 = vadd.xlane.f32.xlu2 %v936_v59 }
 0x206   :  { %v3876_v6 = vpop.eup %3875 }
 0x207   :  { %v922_v1 = vadd.f32 1.0, %v3876_v6  ;;  %v3878_v15 = vpop.eup %3877 }
 0x208   :  { %v948_v56 = vmul.f32 128.0, %v3878_v15  ;;  %vm952_vm13 = vweird.f32 %v3878_v15 }
 0x209   :  { %v930_v7 = vmul.f32 0.5, %v922_v1 }
 0x20a   :  { %v949_v16 = vsub.f32 1.0, %v948_v56 }
 0x20b   :  { %v938_v8 = vmul.f32 %v930_v7, %v865_v52 }
 0x20c   :  { %v950_v17 = vmul.f32 %v3878_v15, %v949_v16 }
 0x20d   :  { %945 = vadd.xlane.f32.xlu0 %v938_v8  ;;  %941 = vadd.xlane.f32.xlu2 %v934_v39 }
 0x20e   :  { %v951_v41 = vadd.f32 %v3878_v15, %v950_v17  ;;  %v114_v17 = vld [vmem:[%s4729_s1 + $0x3] ss:$0 sm:$0xff] }
 0x210   :  { %v953_v42 = vsel %vm952_vm13, %v3878_v15, %v951_v41 }
 0x268   :  { %v940_v60 = vpop.xlane.xlu1 %939 }
 0x269   :  { %v954_v19 = vmul.f32 %v953_v42, %v940_v60  ;;  %v3008_v60 = vld [vmem:[%s4733_s5 + $0xe0] sm:$0xf] }
 0x26b   :  { %v4357_v20 = vsub.f32 %v932_v51, %v954_v19  ;;  %v3702_v19 = vld [vmem:[%s4733_s5 + $0xec] sm:$0xf0] }
 0x26d   :  { %v962_v21 = vmul.f32 %v4357_v20, %v4357_v20 }
 0x26f   :  { %966 = vadd.xlane.f32.xlu2 %v962_v21  ;;  %v3700_v21 = vld [vmem:[%s4733_s5 + $0xe4] sm:$0xf] }
 0x278   :  { %v944_v22 = vpop.xlane.xlu2 %943 }
 0x279   :  { %v956_v23 = vmul.f32 %v953_v42, %v944_v22 }
 0x27b   :  { %v960_v24 = vsub.f32 %v936_v59, %v956_v23 }
 0x27d   :  { %v964_v12 = vmul.f32 %v960_v24, %v960_v24 }
 0x27f   :  { %970 = vadd.xlane.f32.xlu0 %v964_v12  ;;  %v3009_v12 = vor.u32 %v3702_v19, %v3008_v60  ;;  %v2970_v60 = vld [vmem:[%s4733_s5 + $0x98] sm:$0xf0] }
 0x280   :  { %v946_v14 = vpop.xlane.xlu0 %945  ;;  %v942_v18 = vpop.xlane.xlu2 %941 }
 0x281   :  { %v957_v36 = vmul.f32 %v953_v42, %v946_v14  ;;  %v955_v32 = vmul.f32 %v953_v42, %v942_v18  ;;  %v3010_v14 = vld [vmem:[%s4733_s5 + $0xf0] sm:$0xf0]  ;;  %v3016_v18 = vld [vmem:[%s4733_s5 + $0xe8] sm:$0xf]  ;;  %1278 = vmatpush.bf16.msra.mxu1 %v3009_v12  ;;  %v3684_v12 = vld [vmem:[%s4733_s5 + $0x64] sm:$0xf] }
 0x283   :  { %v4361_v43 = vsub.f32 %v938_v8, %v957_v36  ;;  %v959_v35 = vsub.f32 %v934_v39, %v955_v32  ;;  %v3703_v36 = vld [vmem:[%s4733_s5 + $0xf4] sm:$0xf0]  ;;  %v3013_v32 = vor.u32 %v3700_v21, %v3010_v14  ;;  %v3671_v21 = vld [vmem:[%s4731_s3 + $0x8] sm:$0xff]  ;;  %v869_v14 = vmul.f32 %v4351_v53, %v4351_v53 }
 0x285   :  { %v963_v9 = vmul.f32 %v959_v35, %v959_v35  ;;  %v965_v13 = vmul.f32 %v4361_v43, %v4361_v43  ;;  %1297 = vmatpush.bf16.msra.mxu2 %v3013_v32  ;;  %v2952_v32 = vld [vmem:[%s4733_s5 + $0x68] sm:$0xf] }
 0x287   :  { %968 = vadd.xlane.f32.xlu0 %v963_v9  ;;  %972 = vadd.xlane.f32.xlu1 %v965_v13  ;;  %v3698_v13 = vld [vmem:[%s4733_s5 + $0xcc] sm:$0xf0] }
 0x2e2   :  { %v967_v31 = vpop.xlane.xlu2 %966 }
 0x2e3   :  { %v974_v33 = vmul.f32 %v967_v31, %v953_v42  ;;  %v3696_v31 = vld [vmem:[%s4733_s5 + $0xc4] sm:$0xf] }
 0x2e5   :  { %v978_v37 = vadd.f32 1e-05, %v974_v33  ;;  %v2994_v33 = vld [vmem:[%s4733_s5 + $0xd0] sm:$0xf0] }
 0x2e7   :  { %3879 = vrsqrt.f32 %v978_v37  ;;  %vm988_vm3 = vweird.f32 %v978_v37 }
 0x2ed   :  { %v3880_v27 = vpop.eup %3879 }
 0x2ee   :  { %v983_v29 = vmul.f32 %v3880_v27, %v978_v37  ;;  %vm989_vm1 = vweird.f32 %v3880_v27  ;;  %v115_v37 = vld [vmem:[%s4729_s1 + $0x4] ss:$0 sm:$0xff] }
 0x2ef   :  { %vm4365_vm5 = vmor %vm988_vm3, %vm989_vm1 }
 0x2f0   :  { %v984_v52 = vmul.f32 %v3880_v27, %v983_v29 }
 0x2f2   :  { %v971_v44 = vpop.xlane.xlu0 %970  ;;  %v985_v48 = vmul.f32 0.5, %v984_v52 }
 0x2f3   :  { %v976_v26 = vmul.f32 %v971_v44, %v953_v42 }
 0x2f4   :  { %v986_v10 = vsub.f32 1.5, %v985_v48  ;;  %v3018_v48 = vld [vmem:[%s4733_s5 + $0xf8] sm:$0xf0] }
 0x2f5   :  { %v980_v45 = vadd.f32 1e-05, %v976_v26  ;;  %v2997_v26 = vor.u32 %v3696_v31, %v2994_v33  ;;  %v2928_v31 = vld [vmem:[%s4733_s5 + $0x40] sm:$0xf] }
 0x2f6   :  { %v987_v34 = vmul.f32 %v3880_v27, %v986_v10  ;;  %v2960_v10 = vld [vmem:[%s4733_s5 + $0x80] sm:$0xf] }
 0x2f7   :  { %3881 = vrsqrt.f32 %v980_v45  ;;  %vm1008_vm15 = vweird.f32 %v980_v45  ;;  %1298 = vmatpush.bf16.msra.mxu2 %v2997_v26  ;;  %v2930_v26 = vld [vmem:[%s4733_s5 + $0x50] sm:$0xf0] }
 0x2f8   :  { %v991_v15 = vsel %vm4365_vm5, %v3880_v27, %v987_v34  ;;  %v3699_v27 = vld [vmem:[%s4733_s5 + $0xd4] sm:$0xf0]  ;;  %v2968_v34 = vld [vmem:[%s4733_s5 + $0x88] sm:$0xf] }
 0x2f9   :  { %v1022_v22 = vmul.f32 %v991_v15, %v4357_v20  ;;  %v2992_v20 = vld [vmem:[%s4733_s5 + $0xc0] sm:$0xf] }
 0x2fa   :  { %v969_v30 = vpop.xlane.xlu0 %968  ;;  %v973_v28 = vpop.xlane.xlu1 %972  ;;  %v2993_v44 = vor.u32 %v3698_v13, %v2992_v20  ;;  %v2954_v13 = vld [vmem:[%s4733_s5 + $0x78] sm:$0xf0] }
 0x2fb   :  { %v975_v38 = vmul.f32 %v969_v30, %v953_v42  ;;  %v977_v46 = vmul.f32 %v973_v28, %v953_v42  ;;  %v1026_v29 = vmul.f32 %v1022_v22, %v114_v17  ;;  %v867_v22 = vmul.f32 %v4349_v49, %v4349_v49 }
 0x2fc   :  { %1279 = vmatpush.bf16.msra.mxu1 %v2993_v44  ;;  %v3680_v44 = vld [vmem:[%s4733_s5 + $0x44] sm:$0xf] }
 0x2fd   :  { %v3882_v47 = vpop.eup %3881  ;;  %v979_v61 = vadd.f32 1e-05, %v975_v38  ;;  %v981_v50 = vadd.f32 1e-05, %v977_v46  ;;  %v2976_v46 = vld [vmem:[%s4733_s5 + $0xa0] sm:$0xf] }
 0x2fe   :  { %v1003_v51 = vmul.f32 %v3882_v47, %v980_v45  ;;  %vm1009_vm14 = vweird.f32 %v3882_v47  ;;  %v3000_v45 = vld [vmem:[%s4733_s5 + $0xc8] sm:$0xf] }
 0x2ff   :  { %3883 = vrsqrt.f32 %v979_v61  ;;  %vm1010_vm0 = vmor %vm1008_vm15, %vm1009_vm14  ;;  %vm998_vm6 = vweird.f32 %v979_v61  ;;  %vm1018_vm8 = vweird.f32 %v981_v50  ;;  %v3001_v38 = vor.u32 %v3699_v27, %v3000_v45 }
 0x300   :  { %v1004_v54 = vmul.f32 %v3882_v47, %v1003_v51  ;;  %3885 = vrsqrt.f32 %v981_v50  ;;  %v2984_v51 = vld [vmem:[%s4733_s5 + $0xa8] sm:$0xf]  ;;  %v875_v45 = vmul.f32 %v867_v22, %v4349_v49 }
 0x302   :  { %v1005_v55 = vmul.f32 0.5, %v1004_v54 }
 0x304   :  { %v1006_v57 = vsub.f32 1.5, %v1005_v55  ;;  %v3701_v55 = vld [vmem:[%s4733_s5 + $0xec] sm:$0xf] }
 0x305   :  { %v3884_v25 = vpop.eup %3883 }
 0x306   :  { %v3886_v58 = vpop.eup %3885  ;;  %v993_v3 = vmul.f32 %v3884_v25, %v979_v61  ;;  %v1007_v63 = vmul.f32 %v3882_v47, %v1006_v57  ;;  %vm999_vm2 = vweird.f32 %v3884_v25  ;;  %v3692_v61 = vld [vmem:[%s4733_s5 + $0xa4] sm:$0xf] }
 0x307   :  { %v1013_v0 = vmul.f32 %v3886_v58, %v981_v50  ;;  %vm1019_vm4 = vweird.f32 %v3886_v58  ;;  %vm1000_vm7 = vmor %vm998_vm6, %vm999_vm2  ;;  %v2978_v50 = vld [vmem:[%s4733_s5 + $0xb0] sm:$0xf0] }
 0x308   :  { %v994_v2 = vmul.f32 %v3884_v25, %v993_v3  ;;  %v1011_v6 = vsel %vm1010_vm0, %v3882_v47, %v1007_v63  ;;  %vm1020_vm9 = vmor %vm1018_vm8, %vm1019_vm4  ;;  %v3694_v47 = vld [vmem:[%s4733_s5 + $0xac] sm:$0xf0] }
 0x309   :  { %v1014_v11 = vmul.f32 %v3886_v58, %v1013_v0  ;;  %v1024_v39 = vmul.f32 %v1011_v6, %v960_v24  ;;  %v2977_v57 = vor.u32 %v3694_v47, %v2976_v46  ;;  %v3690_v63 = vld [vmem:[%s4733_s5 + $0x8c] sm:$0xf0]  ;;  %v1030_v0 = vadd.f32 %v1026_v29, %v115_v37  ;;  %v3691_v6 = vld [vmem:[%s4733_s5 + $0x94] sm:$0xf0] }
 0x30a   :  { %v995_v59 = vmul.f32 0.5, %v994_v2  ;;  %v3688_v2 = vld [vmem:[%s4733_s5 + $0x84] sm:$0xf]  ;;  %v2961_v8 = vor.u32 %v3690_v63, %v2960_v10  ;;  %v2969_v15 = vor.u32 %v3691_v6, %v2968_v34  ;;  %v3683_v29 = vld [vmem:[%s4733_s5 + $0x54] sm:$0xf0]  ;;  %v877_v46 = vmul.f32 %v869_v14, %v4351_v53 }
 0x30b   :  { %v1015_v1 = vmul.f32 0.5, %v1014_v11  ;;  %v1028_v24 = vmul.f32 %v1024_v39, %v114_v17  ;;  %v2962_v11 = vld [vmem:[%s4733_s5 + $0x90] sm:$0xf0]  ;;  %1280 = vmatpush.bf16.msra.mxu1 %v2977_v57  ;;  %v3670_v39 = vld [vmem:[%s4731_s3] sm:$0xff] }
 0x30c   :  { %v996_v5 = vsub.f32 1.5, %v995_v59  ;;  %v3021_v59 = vor.u32 %v3701_v55, %v3018_v48  ;;  %v3678_v55 = vld [vmem:[%s4733_s5 + $0x2c] sm:$0xf0]  ;;  %v3676_v48 = vld [vmem:[%s4733_s5 + $0x24] sm:$0xf] }
 0x30d   :  { %v1016_v7 = vsub.f32 1.5, %v1015_v1  ;;  %v1032_v30 = vadd.f32 %v1028_v24, %v115_v37  ;;  %v3686_v24 = vld [vmem:[%s4733_s5 + $0x6c] sm:$0xf0] }
 0x30e   :  { %v997_v40 = vmul.f32 %v3884_v25, %v996_v5  ;;  %v3697_v5 = vld [vmem:[%s4733_s5 + $0xcc] sm:$0xf] }
 0x30f   :  { %v1017_v56 = vmul.f32 %v3886_v58, %v1016_v7  ;;  %v3002_v7 = vld [vmem:[%s4733_s5 + $0xd8] sm:$0xf0]  ;;  %1281 = vmatpush.bf16.msra.mxu1 %v2961_v8 }
 0x310   :  { %v1001_v16 = vsel %vm1000_vm7, %v3884_v25, %v997_v40  ;;  %v3695_v25 = vld [vmem:[%s4733_s5 + $0xb4] sm:$0xf0]  ;;  %v2965_v40 = vor.u32 %v3688_v2, %v2962_v11  ;;  %v3677_v2 = vld [vmem:[%s4733_s5 + $0x2c] sm:$0xf]  ;;  %v2922_v11 = vld [vmem:[%s4733_s5 + $0x38] sm:$0xf0] }
 0x311   :  { %v1023_v41 = vmul.f32 %v1001_v16, %v959_v35  ;;  %v1021_v42 = vsel %vm1020_vm9, %v3886_v58, %v1017_v56  ;;  %v3017_v35 = vor.u32 %v3703_v36, %v3016_v18  ;;  %v2981_v58 = vor.u32 %v3692_v61, %v2978_v50  ;;  %v3693_v16 = vld [vmem:[%s4733_s5 + $0xac] sm:$0xf]  ;;  %v2946_v36 = vld [vmem:[%s4733_s5 + $0x70] sm:$0xf0]  ;;  %v2938_v61 = vld [vmem:[%s4733_s5 + $0x58] sm:$0xf0] }
 0x312   :  { %v1025_v23 = vmul.f32 %v1021_v42, %v4361_v43  ;;  %v2985_v3 = vor.u32 %v3695_v25, %v2984_v51  ;;  %v3005_v56 = vor.u32 %v3697_v5, %v3002_v7  ;;  %v3689_v42 = vld [vmem:[%s4733_s5 + $0x8c] sm:$0xf]  ;;  %v2949_v20 = vor.u32 %v3684_v12, %v2946_v36  ;;  %v2914_v25 = vld [vmem:[%s4733_s5 + $0x30] sm:$0xf0]  ;;  %v3672_v5 = vld [vmem:[%s4733_s5 + $0x4] sm:$0xf] }
 0x313   :  { %v1027_v9 = vmul.f32 %v1023_v41, %v114_v17  ;;  %1316 = vmatpush.bf16.msra.mxu3 %v3017_v35  ;;  %1299 = vmatpush.bf16.msra.mxu2 %v2981_v58  ;;  %v2973_v19 = vor.u32 %v3689_v42, %v2970_v60  ;;  %v3687_v35 = vld [vmem:[%s4733_s5 + $0x74] sm:$0xf0]  ;;  %v883_v51 = vmul.f32 0.044715, %v875_v45  ;;  %v2920_v58 = vld [vmem:[%s4733_s5 + $0x28] sm:$0xf]  ;;  %v2917_v63 = vor.u32 %v3676_v48, %v2914_v25 }
 0x314   :  { %v1029_v43 = vmul.f32 %v1025_v23, %v114_v17  ;;  %v2986_v17 = vld [vmem:[%s4733_s5 + $0xb8] sm:$0xf0]  ;;  %v2944_v23 = vld [vmem:[%s4733_s5 + $0x60] sm:$0xf]  ;;  %v2925_v6 = vor.u32 %v3677_v2, %v2922_v11  ;;  %v2898_v7 = vld [vmem:[%s4733_s5 + $0x10] sm:$0xf0]  ;;  %v871_v42 = vmul.f32 %v4353_v4, %v4353_v4 }
 0x315   :  { %v1031_v54 = vadd.f32 %v1027_v9, %v115_v37  ;;  %v2989_v41 = vor.u32 %v3693_v16, %v2986_v17  ;;  %v2945_v18 = vor.u32 %v3686_v24, %v2944_v23  ;;  %v3685_v9 = vld [vmem:[%s4733_s5 + $0x6c] sm:$0xf]  ;;  %v891_v10 = vadd.f32 %v883_v51, %v4349_v49  ;;  %v2906_v17 = vld [vmem:[%s4733_s5 + $0x18] sm:$0xf0] }
 0x316   :  { %v1033_v28 = vadd.f32 %v1029_v43, %v115_v37  ;;  %v2953_v43 = vor.u32 %v3687_v35, %v2952_v32  ;;  %v2957_v33 = vor.u32 %v3685_v9, %v2954_v13  ;;  %v3682_v37 = vld [vmem:[%s4733_s5 + $0x4c] sm:$0xf0]  ;;  %v879_v22 = vmul.f32 %v871_v42, %v4353_v4 }
 0x317   :  { %1317 = vmatpush.bf16.msra.mxu3 %v3001_v38  ;;  %v1038_v1 = vpack.c.bf16 %v1031_v54, %v1030_v0  ;;  %1300 = vmatpush.bf16.msra.mxu2 %v2965_v40  ;;  %v2929_v27 = vor.u32 %v3682_v37, %v2928_v31  ;;  %v3681_v38 = vld [vmem:[%s4733_s5 + $0x4c] sm:$0xf]  ;;  %v2912_v54 = vld [vmem:[%s4733_s5 + $0x20] sm:$0xf]  ;;  %v2904_v40 = vld [vmem:[%s4733_s5 + $0x8] sm:$0xf] }
 0x318   :  { %v1039_v52 = vpack.c.bf16 %v1033_v28, %v1032_v30  ;;  %1282 = vmatpush.bf16.msra.mxu1 %v2945_v18  ;;  %v2933_v30 = vor.u32 %v3680_v44, %v2930_v26  ;;  %v2936_v28 = vld [vmem:[%s4733_s5 + $0x48] sm:$0xf]  ;;  %v2941_v50 = vor.u32 %v3681_v38, %v2938_v61  ;;  %v2913_v57 = vor.u32 %v3678_v55, %v2912_v54  ;;  %v1040_v31 = vld [vmem:[#allocation4] sm:$0xff]  ;;  %v1042_v54 = vld [vmem:[#allocation4 + $0x10] sm:$0xff] }
 0x319   :  { %v2937_v47 = vor.u32 %v3683_v29, %v2936_v28  ;;  %v887_v24 = vmul.f32 0.044715, %v879_v22  ;;  %v1041_v44 = vld [vmem:[#allocation4 + $0x8] sm:$0xff]  ;;  %v3896_v22 = vld [vmem:[%s4728_s0 + $0x20] sm:$0xff] }
 0x31a   :  { %1067 = vmatpush.bf16.msra.mxu0 %v1039_v52  ;;  %v885_v52 = vmul.f32 0.044715, %v877_v46 }
 0x31b   :  { %1318 = vmatpush.bf16.msra.mxu3 %v2985_v3  ;;  %1301 = vmatpush.bf16.msra.mxu2 %v2949_v20  ;;  %v3679_v3 = vld [vmem:[%s4733_s5 + $0x34] sm:$0xf0]  ;;  %v895_v36 = vadd.f32 %v887_v24, %v4353_v4  ;;  %v3897_v24 = vld [vmem:[%s4728_s0 + $0x60] sm:$0xff] }
 0x31c   :  { %1283 = vmatpush.bf16.msra.mxu1 %v2929_v27  ;;  %v2921_v0 = vor.u32 %v3679_v3, %v2920_v58  ;;  %v893_v34 = vadd.f32 %v885_v52, %v4351_v53 }
 0x31d   :  { %v903_v9 = vmul.f32 0.7978846, %v895_v36  ;;  %v3898_v36 = vld [vmem:[%s4728_s0 + $0x78] sm:$0xff] }
 0x31e   :  { %1068 = vmatpush.bf16.msra.mxu0 %v1038_v1  ;;  %v3674_v1 = vld [vmem:[%s4733_s5 + $0xc] sm:$0xf0] }
 0x31f   :  { %1319 = vmatpush.bf16.msra.mxu3 %v2969_v15  ;;  %1302 = vmatpush.bf16.msra.mxu2 %v2933_v30  ;;  %v3675_v15 = vld [vmem:[%s4733_s5 + $0x14] sm:$0xf0] }
 0x320   :  { %1284 = vmatpush.bf16.msra.mxu1 %v2913_v57  ;;  %v2905_v16 = vor.u32 %v3675_v15, %v2904_v40  ;;  %v1043_v57 = vld [vmem:[#allocation4 + $0x18] sm:$0xff]  ;;  %v3088_v40 = vld [vmem:[#allocation6 + $0x270] sm:$0xf] }
 0x321   :  { %2892 = vmatmul.msk.bf16.vlgmr.msra.gmra.mxu0 %vm1054_vm10, %v3670_v39  ;;  %v2901_v39 = vor.u32 %v3672_v5, %v2898_v7  ;;  %v3784_v15 = vld [vmem:[#allocation6 + $0x274] sm:$0xf0] }
 0x322   :  { %1335 = vmatpush.bf16.msrb.mxu0 %v3021_v59  ;;  %v2896_v59 = vld [vmem:[%s4733_s5] sm:$0xf]  ;;  %v3089_v42 = vor.u32 %v3784_v15, %v3088_v40 }
 0x323   :  { %1320 = vmatpush.bf16.msra.mxu3 %v2953_v43  ;;  %1303 = vmatpush.bf16.msra.mxu2 %v2917_v63  ;;  %v2897_v8 = vor.u32 %v3674_v1, %v2896_v59 }
 0x325   :  { %1285 = vmatpush.bf16.msra.mxu1 %v2897_v8  ;;  %v2626_v8 = vld [vmem:[%s4729_s1 + $0x5] ss:$8 sm:$0xf] }
 0x326   :  { %1336 = vmatpush.bf16.msrb.mxu0 %v3005_v56  ;;  %v3673_v56 = vld [vmem:[%s4733_s5 + $0xc] sm:$0xf] }
 0x327   :  { %1321 = vmatpush.bf16.msra.mxu3 %v2937_v47  ;;  %v2909_v60 = vor.u32 %v3673_v56, %v2906_v17  ;;  %1304 = vmatpush.bf16.msra.mxu2 %v2901_v39  ;;  %v3080_v56 = vld [vmem:[#allocation6 + $0x260] sm:$0xf] }
 0x32a   :  { %1337 = vmatpush.bf16.msrb.mxu0 %v2989_v41  ;;  %v899_v41 = vmul.f32 0.7978846, %v891_v10 }
 0x32b   :  { %1322 = vmatpush.bf16.msra.mxu3 %v2921_v0 }
 0x32c   :  { %3887 = vtanh.f32 %v899_v41 }
 0x32e   :  { %1338 = vmatpush.bf16.msrb.mxu0 %v2973_v19  ;;  %v901_v19 = vmul.f32 0.7978846, %v893_v34 }
 0x32f   :  { %1323 = vmatpush.bf16.msra.mxu3 %v2905_v16  ;;  %v3895_v16 = vld [vmem:[%s4728_s0 + $0x40] sm:$0xff] }
 0x330   :  { %3889 = vtanh.f32 %v901_v19 }
 0x331   :  { %2893 = vmatmul.msk.bf16.gmra.mxu0 %vm1054_vm10, %v3671_v21  ;;  %v873_v21 = vmul.f32 %v4355_v62, %v4355_v62  ;;  %3891 = vtanh.f32 %v903_v9 }
 0x332   :  { %1339 = vmatpush.bf16.msrb.mxu0 %v2957_v33  ;;  %v3888_v14 = vpop.eup %3887 }
 0x333   :  { %v881_v23 = vmul.f32 %v873_v21, %v4355_v62  ;;  %v915_v20 = vadd.f32 1.0, %v3888_v14  ;;  %v1371_v21 = vperm.slane %v2626_v8, 0 }
 0x335   :  { %v889_v12 = vmul.f32 0.044715, %v881_v23  ;;  %v923_v33 = vmul.f32 0.5, %v915_v20  ;;  %v3780_v20 = vld [vmem:[#allocation6 + $0x254] sm:$0xf0] }
 0x336   :  { %1340 = vmatpush.bf16.msrb.mxu0 %v2941_v50  ;;  %v3890_v18 = vpop.eup %3889 }
 0x337   :  { %v897_v32 = vadd.f32 %v889_v12, %v4355_v62  ;;  %v917_v43 = vadd.f32 1.0, %v3890_v18  ;;  %v931_v27 = vmul.f32 %v923_v33, %v4349_v49  ;;  %v3892_v46 = vpop.eup %3891  ;;  %v1374_v33 = vperm.slane %v2626_v8, 3 }
 0x338   :  { %v919_v51 = vadd.f32 1.0, %v3892_v46  ;;  %v3902_v46 = vld [vmem:[%s4728_s0 + $0x18] sm:$0xff] }
 0x339   :  { %v905_v13 = vmul.f32 0.7978846, %v897_v32  ;;  %v925_v37 = vmul.f32 0.5, %v917_v43  ;;  %v3899_v43 = vld [vmem:[%s4728_s0] sm:$0xff] }
 0x33a   :  { %1341 = vmatpush.bf16.msrb.mxu0 %v2925_v6  ;;  %v927_v55 = vmul.f32 0.5, %v919_v51  ;;  %v3904_v51 = vld [vmem:[%s4728_s0 + $0x50] sm:$0xff] }
 0x33b   :  { %3893 = vtanh.f32 %v905_v13  ;;  %v933_v30 = vmul.f32 %v925_v37, %v4351_v53  ;;  %v1372_v37 = vperm.slane %v2626_v8, 1 }
 0x33c   :  { %v935_v53 = vmul.f32 %v927_v55, %v4353_v4 }
 0x33e   :  { %1342 = vmatpush.bf16.msrb.mxu0 %v2909_v60  ;;  %v3782_v60 = vld [vmem:[#allocation6 + $0x264] sm:$0xf0] }
 0x33f   :  { %v3081_v18 = vor.u32 %v3782_v60, %v3080_v56 }
 0x341   :  { %v3894_v61 = vpop.eup %3893 }
 0x342   :  { %v921_v52 = vadd.f32 1.0, %v3894_v61  ;;  %1925 = vmatpush.bf16.msra.mxu0 %v3089_v42  ;;  %v3903_v61 = vld [vmem:[%s4728_s0 + $0x38] sm:$0xff] }
 0x344   :  { %v929_v48 = vmul.f32 0.5, %v921_v52 }
 0x346   :  { %v937_v58 = vmul.f32 %v929_v48, %v4355_v62  ;;  %1926 = vmatpush.bf16.msra.mxu0 %v3081_v18  ;;  %v3064_v48 = vld [vmem:[#allocation6 + $0x240] sm:$0xf]  ;;  %v3280_v18 = vld [vmem:[#allocation6 + $0x3f0] sm:$0xf] }
 0x39e   :  { %v1070_v35 = vpop.f32.mrf.mxu0 }
 0x39f   :  { %v1071_v26 = vadd.f32 %v1070_v35, %v1040_v31  ;;  %v3072_v35 = vld [vmem:[#allocation6 + $0x250] sm:$0xf] }
 0x3a1   :  { %v1080_v29 = vmul.f32 %v1071_v26, %v931_v27  ;;  %v3900_v26 = vld [vmem:[%s4728_s0 + $0x58] sm:$0xff] }
 0x3a6   :  { %v1072_v45 = vpop.f32.mrf.mxu0 }
 0x3a7   :  { %v1073_v28 = vadd.f32 %v1072_v45, %v1041_v44  ;;  %v4621_v44 = vperm.slane %v2626_v8, 2 }
 0x3a9   :  { %v1081_v38 = vmul.f32 %v1073_v28, %v933_v30  ;;  %v3901_v30 = vld [vmem:[%s4728_s0 + $0x48] sm:$0xff] }
 0x3ab   :  { %v1084_v47 = vpack.c.bf16 %v1081_v38, %v1080_v29  ;;  %v3073_v38 = vor.u32 %v3780_v20, %v3072_v35 }
 0x3ad   :  { %1286 = vmatmul.bf16.vlgmr.msra.gmra.mxu1 %v1084_v47  ;;  %1305 = vmatmul.bf16.vlgmr.msra.gmra.mxu2 %v1084_v47 }
 0x3ae   :  { %1324 = vmatmul.bf16.vlgmr.msra.gmra.mxu3 %v1084_v47  ;;  %1343 = vmatmul.bf16.vlgmr.msrb.gmra.mxu0 %v1084_v47  ;;  %v1075_v50 = vpop.f32.mrf.mxu0 }
 0x3af   :  { %v1076_v49 = vadd.f32 %v1075_v50, %v1042_v54  ;;  %1927 = vmatpush.bf16.msra.mxu0 %v3073_v38  ;;  %v3272_v38 = vld [vmem:[#allocation6 + $0x3e0] sm:$0xf] }
 0x3b1   :  { %v1082_v10 = vmul.f32 %v1076_v49, %v935_v53 }
 0x3b6   :  { %v1077_v25 = vpop.f32.mrf.mxu0 }
 0x3b7   :  { %v1078_v3 = vadd.f32 %v1077_v25, %v1043_v57  ;;  %v3778_v57 = vld [vmem:[#allocation6 + $0x244] sm:$0xf0] }
 0x3b8   :  { %v3905_v25 = vld [vmem:[%s4728_s0 + $0x8] sm:$0xff]  ;;  %v3065_v40 = vor.u32 %v3778_v57, %v3064_v48  ;;  %v3812_v57 = vld [vmem:[#allocation6 + $0x354] sm:$0xf0] }
 0x3b9   :  { %v1083_v63 = vmul.f32 %v1078_v3, %v937_v58  ;;  %v3906_v58 = vld [vmem:[%s4728_s0 + $0x28] sm:$0xff] }
 0x3ba   :  { %1928 = vmatpush.bf16.msra.mxu0 %v3065_v40 }
 0x3bb   :  { %v1085_v0 = vpack.c.bf16 %v1083_v63, %v1082_v10  ;;  %v3907_v10 = vld [vmem:[%s4728_s0 + $0x68] sm:$0xff] }
 0x3bd   :  { %1291 = vmatmul.bf16.gmra.mxu1 %v1085_v0  ;;  %1310 = vmatmul.bf16.gmra.mxu2 %v1085_v0 }
 0x3be   :  { %1329 = vmatmul.bf16.gmra.mxu3 %v1085_v0  ;;  %1348 = vmatmul.bf16.gmra.mxu0 %v1085_v0 }
 0x42a   :  { %v1287_v2 = vpop.f32.mrf.mxu1 }
 0x42b   :  { %v1344_v11 = vpop.f32.mrf.mxu0  ;;  %v1354_v9 = vadd.f32 %v3899_v43, %v1287_v2  ;;  %v3908_v2 = vld [vmem:[%s4728_s0 + $0x10] sm:$0xff] }
 0x42c   :  { %v1357_v47 = vadd.f32 %v3902_v46, %v1344_v11  ;;  %v3830_v46 = vld [vmem:[#allocation6 + $0x3e4] sm:$0xf0] }
 0x42d   :  { %v1379_v49 = vadd.f32 %v1371_v21, %v1354_v9  ;;  %v3273_v48 = vor.u32 %v3830_v46, %v3272_v38  ;;  %v3066_v38 = vld [vmem:[#allocation6 + $0x248] sm:$0xf0] }
 0x430   :  { %v1306_v59 = vpop.f32.mrf.mxu2 }
 0x431   :  { %v4599_v34 = vpop.f32.mrf.mxu3  ;;  %v1355_v53 = vadd.f32 %v3905_v25, %v1306_v59  ;;  %v3909_v59 = vld [vmem:[%s4728_s0 + $0x30] sm:$0xff]  ;;  %v3828_v25 = vld [vmem:[#allocation6 + $0x3d4] sm:$0xf0] }
 0x432   :  { %v1289_v6 = vpop.f32.mrf.mxu1  ;;  %v1356_v11 = vadd.f32 %v3908_v2, %v4599_v34  ;;  %v3794_v2 = vld [vmem:[#allocation6 + $0x2c4] sm:$0xf0] }
 0x433   :  { %v1346_v1 = vpop.f32.mrf.mxu0  ;;  %v1358_v23 = vadd.f32 %v3896_v22, %v1289_v6  ;;  %v3216_v22 = vld [vmem:[#allocation6 + $0x370] sm:$0xf] }
 0x434   :  { %v1361_v50 = vadd.f32 %v3903_v61, %v1346_v1  ;;  %v1381_v20 = vadd.f32 %v4621_v44, %v1356_v11  ;;  %v3040_v61 = vld [vmem:[#allocation6 + $0x210] sm:$0xf]  ;;  %v3192_v11 = vld [vmem:[#allocation6 + $0x340] sm:$0xf] }
 0x435   :  { %v1383_v27 = vadd.f32 %v1371_v21, %v1358_v23  ;;  %v1382_v23 = vadd.f32 %v1374_v33, %v1357_v47 }
 0x436   :  { %v1386_v15 = vadd.f32 %v1374_v33, %v1361_v50  ;;  %v3772_v50 = vld [vmem:[#allocation6 + $0x214] sm:$0xf0] }
 0x438   :  { %v1308_v5 = vpop.f32.mrf.mxu2  ;;  %v1400_v43 = vpack.c.bf16 %v1386_v15, %v1382_v23  ;;  %v3120_v15 = vld [vmem:[#allocation6 + $0x2b0] sm:$0xf] }
 0x439   :  { %v4601_v7 = vpop.f32.mrf.mxu3  ;;  %v1359_v3 = vadd.f32 %v3906_v58, %v1308_v5  ;;  %v3910_v5 = vld [vmem:[%s4728_s0 + $0x70] sm:$0xff] }
 0x43a   :  { %v1292_v4 = vpop.f32.mrf.mxu1  ;;  %v1360_v6 = vadd.f32 %v3909_v59, %v4601_v7  ;;  %v4663_v7 = vld [vmem:[%s4731_s3 + $0x10] sm:$0xff] }
 0x43b   :  { %v1349_v62 = vpop.f32.mrf.mxu0  ;;  %v1362_v17 = vadd.f32 %v3895_v16, %v1292_v4  ;;  %v1384_v42 = vadd.f32 %v1372_v37, %v1359_v3  ;;  %v3032_v3 = vld [vmem:[#allocation6 + $0x200] sm:$0xf] }
 0x43c   :  { %v1365_v45 = vadd.f32 %v3900_v26, %v1349_v62 }
 0x43d   :  { %v1387_v13 = vadd.f32 %v1371_v21, %v1362_v17  ;;  %v3056_v17 = vld [vmem:[#allocation6 + $0x230] sm:$0xf] }
 0x43e   :  { %v1390_v1 = vadd.f32 %v1374_v33, %v1365_v45  ;;  %v3144_v45 = vld [vmem:[#allocation6 + $0x2e0] sm:$0xf] }
 0x440   :  { %v1311_v39 = vpop.f32.mrf.mxu2 }
 0x441   :  { %v1330_v41 = vpop.f32.mrf.mxu3  ;;  %v1363_v28 = vadd.f32 %v3901_v30, %v1311_v39  ;;  %v1397_v39 = vpack.c.bf16 %v1383_v27, %v1379_v49  ;;  %v3798_v27 = vld [vmem:[#allocation6 + $0x2e4] sm:$0xf0]  ;;  %v3208_v30 = vld [vmem:[#allocation6 + $0x360] sm:$0xf]  ;;  %v3264_v49 = vld [vmem:[#allocation6 + $0x3d0] sm:$0xf] }
 0x442   :  { %v1294_v19 = vpop.f32.mrf.mxu1  ;;  %v1364_v52 = vadd.f32 %v3904_v51, %v1330_v41  ;;  %v3776_v41 = vld [vmem:[#allocation6 + $0x234] sm:$0xf0]  ;;  %v3145_v47 = vor.u32 %v3798_v27, %v3144_v45  ;;  %v3265_v59 = vor.u32 %v3828_v25, %v3264_v49  ;;  %v3218_v49 = vld [vmem:[#allocation6 + $0x378] sm:$0xf0]  ;;  %v3224_v25 = vld [vmem:[#allocation6 + $0x380] sm:$0xf] }
 0x443   :  { %v1366_v12 = vadd.f32 %v3897_v24, %v1294_v19  ;;  %v1351_v14 = vpop.f32.mrf.mxu0  ;;  %v1388_v62 = vadd.f32 %v1372_v37, %v1363_v28  ;;  %v3152_v19 = vld [vmem:[#allocation6 + $0x2f0] sm:$0xf]  ;;  %v1385_v24 = vadd.f32 %v4621_v44, %v1360_v6  ;;  %v3057_v35 = vor.u32 %v3776_v41, %v3056_v17  ;;  %v3810_v6 = vld [vmem:[#allocation6 + $0x344] sm:$0xf0]  ;;  %v3808_v17 = vld [vmem:[#allocation6 + $0x334] sm:$0xf0] }
 0x444   :  { %v1369_v32 = vadd.f32 %v3898_v36, %v1351_v14  ;;  %v1389_v34 = vadd.f32 %v4621_v44, %v1364_v52  ;;  %v3816_v14 = vld [vmem:[#allocation6 + $0x374] sm:$0xf0]  ;;  %v3136_v52 = vld [vmem:[#allocation6 + $0x2d0] sm:$0xf]  ;;  %v3193_v40 = vor.u32 %v3810_v6, %v3192_v11 }
 0x445   :  { %v1391_v31 = vadd.f32 %v1371_v21, %v1366_v12  ;;  %v3800_v21 = vld [vmem:[#allocation6 + $0x2f4] sm:$0xf0]  ;;  %v3217_v26 = vor.u32 %v3816_v14, %v3216_v22  ;;  %1929 = vmatpush.bf16.msra.mxu0 %v3057_v35  ;;  %v3176_v14 = vld [vmem:[#allocation6 + $0x320] sm:$0xf] }
 0x446   :  { %v1394_v54 = vadd.f32 %v1374_v33, %v1369_v32  ;;  %v3832_v36 = vld [vmem:[#allocation6 + $0x3f4] sm:$0xf0]  ;;  %v1380_v32 = vadd.f32 %v1372_v37, %v1355_v53  ;;  %v3153_v9 = vor.u32 %v3800_v21, %v3152_v19  ;;  %v3041_v53 = vor.u32 %v3772_v50, %v3040_v61  ;;  %v3781_v19 = vld [vmem:[#allocation6 + $0x264] sm:$0xf]  ;;  %v3082_v21 = vld [vmem:[#allocation6 + $0x268] sm:$0xf0] }
 0x447   :  { %v1401_v29 = vpack.c.bf16 %v1391_v31, %v1387_v13  ;;  %v3048_v13 = vld [vmem:[#allocation6 + $0x220] sm:$0xf]  ;;  %v3774_v31 = vld [vmem:[#allocation6 + $0x224] sm:$0xf0]  ;;  %v3281_v28 = vor.u32 %v3832_v36, %v3280_v18  ;;  %v3804_v27 = vld [vmem:[#allocation6 + $0x314] sm:$0xf0] }
 0x448   :  { %v1313_v55 = vpop.f32.mrf.mxu2  ;;  %v1404_v56 = vpack.c.bf16 %v1394_v54, %v1390_v1  ;;  %v1398_v33 = vpack.c.bf16 %v1384_v42, %v1380_v32  ;;  %v3796_v54 = vld [vmem:[#allocation6 + $0x2d4] sm:$0xf0]  ;;  %v3256_v1 = vld [vmem:[#allocation6 + $0x3c0] sm:$0xf]  ;;  %v3248_v42 = vld [vmem:[#allocation6 + $0x3b0] sm:$0xf]  ;;  %v3085_v32 = vor.u32 %v3781_v19, %v3082_v21 }
 0x449   :  { %v1367_v63 = vadd.f32 %v3907_v10, %v1313_v55  ;;  %v1332_v0 = vpop.f32.mrf.mxu3  ;;  %1419 = vmatpush.bf16.msrb.mxu1 %v1401_v29  ;;  %v3814_v29 = vld [vmem:[#allocation6 + $0x364] sm:$0xf0]  ;;  %v3200_v55 = vld [vmem:[#allocation6 + $0x350] sm:$0xf]  ;;  %v3137_v58 = vor.u32 %v3796_v54, %v3136_v52  ;;  %v3240_v35 = vld [vmem:[#allocation6 + $0x3a0] sm:$0xf] }
 0x44a   :  { %v1368_v4 = vadd.f32 %v3910_v5, %v1332_v0  ;;  %v3209_v51 = vor.u32 %v3814_v29, %v3208_v30  ;;  %v3770_v10 = vld [vmem:[#allocation6 + $0x204] sm:$0xf0]  ;;  %v3128_v0 = vld [vmem:[#allocation6 + $0x2c0] sm:$0xf]  ;;  %v3777_v29 = vld [vmem:[#allocation6 + $0x244] sm:$0xf] }
 0x44b   :  { %v1392_v8 = vadd.f32 %v1372_v37, %v1367_v63  ;;  %v1399_v37 = vpack.c.bf16 %v1385_v24, %v1381_v20  ;;  %v3201_v63 = vor.u32 %v3812_v57, %v3200_v55  ;;  %v3826_v5 = vld [vmem:[#allocation6 + $0x3c4] sm:$0xf0]  ;;  %v3112_v24 = vld [vmem:[#allocation6 + $0x2a0] sm:$0xf]  ;;  %v3799_v54 = vld [vmem:[#allocation6 + $0x2f4] sm:$0xf]  ;;  %v3069_v55 = vor.u32 %v3777_v29, %v3066_v38 }
 0x44c   :  { %v1393_v16 = vadd.f32 %v4621_v44, %v1368_v4  ;;  %v3049_v44 = vor.u32 %v3774_v31, %v3048_v13  ;;  %v3033_v4 = vor.u32 %v3770_v10, %v3032_v3  ;;  %v3806_v36 = vld [vmem:[#allocation6 + $0x324] sm:$0xf0]  ;;  %v3104_v31 = vld [vmem:[#allocation6 + $0x290] sm:$0xf]  ;;  %v3160_v50 = vld [vmem:[#allocation6 + $0x300] sm:$0xf] }
 0x44d   :  { %v1402_v60 = vpack.c.bf16 %v1392_v8, %v1388_v62  ;;  %1420 = vmatpush.bf16.msrb.mxu1 %v1397_v39  ;;  %v3783_v62 = vld [vmem:[#allocation6 + $0x274] sm:$0xf]  ;;  %v3090_v8 = vld [vmem:[#allocation6 + $0x278] sm:$0xf0]  ;;  %v3129_v39 = vor.u32 %v3794_v2, %v3128_v0  ;;  %v3822_v20 = vld [vmem:[#allocation6 + $0x3a4] sm:$0xf0] }
 0x44e   :  { %v1403_v12 = vpack.c.bf16 %v1393_v16, %v1389_v34  ;;  %1930 = vmatpush.bf16.msra.mxu0 %v3049_v44  ;;  %v3792_v34 = vld [vmem:[#allocation6 + $0x2b4] sm:$0xf0]  ;;  %v3257_v16 = vor.u32 %v3826_v5, %v3256_v1  ;;  %v3093_v41 = vor.u32 %v3783_v62, %v3090_v8  ;;  %v3241_v45 = vor.u32 %v3822_v20, %v3240_v35  ;;  %v3096_v44 = vld [vmem:[#allocation6 + $0x280] sm:$0xf]  ;;  %v3815_v57 = vld [vmem:[#allocation6 + $0x374] sm:$0xf] }
 0x44f   :  { %1433 = vmatpush.bf16.msrb.mxu2 %v1402_v60  ;;  %v3824_v60 = vld [vmem:[#allocation6 + $0x3b4] sm:$0xf0]  ;;  %v3121_v22 = vor.u32 %v3792_v34, %v3120_v15  ;;  %v3058_v10 = vld [vmem:[#allocation6 + $0x238] sm:$0xf0]  ;;  %v3797_v1 = vld [vmem:[#allocation6 + $0x2e4] sm:$0xf] }
 0x450   :  { %1447 = vmatpush.bf16.msrb.mxu3 %v1403_v12  ;;  %3026 = vmatmul.msk.bf16.vlgmr.msrb.gmra.mxu1 %vm1054_vm10, %v4663_v7  ;;  %v3790_v12 = vld [vmem:[#allocation6 + $0x2a4] sm:$0xf0]  ;;  %v3249_v18 = vor.u32 %v3824_v60, %v3248_v42  ;;  %v3282_v0 = vld [vmem:[#allocation6 + $0x3f8] sm:$0xf0]  ;;  %v3146_v5 = vld [vmem:[#allocation6 + $0x2e8] sm:$0xf0] }
 0x451   :  { %1461 = vmatpush.bf16.msra.mxu1 %v1404_v56  ;;  %v3184_v56 = vld [vmem:[#allocation6 + $0x330] sm:$0xf]  ;;  %v3113_v13 = vor.u32 %v3790_v12, %v3112_v24  ;;  %v3813_v62 = vld [vmem:[#allocation6 + $0x364] sm:$0xf]  ;;  %v3210_v8 = vld [vmem:[#allocation6 + $0x368] sm:$0xf0] }
 0x452   :  { %1931 = vmatpush.bf16.msra.mxu0 %v3041_v53  ;;  %v3185_v23 = vor.u32 %v3808_v17, %v3184_v56  ;;  %v3818_v53 = vld [vmem:[#allocation6 + $0x384] sm:$0xf0]  ;;  %v3213_v15 = vor.u32 %v3813_v62, %v3210_v8  ;;  %v3773_v34 = vld [vmem:[#allocation6 + $0x224] sm:$0xf]  ;;  %v3050_v56 = vld [vmem:[#allocation6 + $0x228] sm:$0xf0] }
 0x453   :  { %1434 = vmatpush.bf16.msrb.mxu2 %v1398_v33  ;;  %v3788_v33 = vld [vmem:[#allocation6 + $0x294] sm:$0xf0]  ;;  %v3225_v6 = vor.u32 %v3818_v53, %v3224_v25  ;;  %v3053_v17 = vor.u32 %v3773_v34, %v3050_v56  ;;  %v3811_v42 = vld [vmem:[#allocation6 + $0x354] sm:$0xf]  ;;  %v3202_v60 = vld [vmem:[#allocation6 + $0x358] sm:$0xf0] }
 0x454   :  { %1448 = vmatpush.bf16.msrb.mxu3 %v1399_v37  ;;  %v3820_v37 = vld [vmem:[#allocation6 + $0x394] sm:$0xf0]  ;;  %v3105_v46 = vor.u32 %v3788_v33, %v3104_v31  ;;  %v3205_v21 = vor.u32 %v3811_v42, %v3202_v60  ;;  %v3771_v24 = vld [vmem:[#allocation6 + $0x214] sm:$0xf]  ;;  %v3809_v20 = vld [vmem:[#allocation6 + $0x344] sm:$0xf] }
 0x455   :  { %1462 = vmatpush.bf16.msra.mxu1 %v1400_v43  ;;  %v3779_v43 = vld [vmem:[#allocation6 + $0x254] sm:$0xf]  ;;  %v3769_v33 = vld [vmem:[#allocation6 + $0x204] sm:$0xf]  ;;  %v3106_v53 = vld [vmem:[#allocation6 + $0x298] sm:$0xf0] }
 0x456   :  { %3027 = vmatmul.msk.bf16.vlgmr.msrb.gmra.mxu2 %vm1054_vm10, %v4663_v7  ;;  %1932 = vmatpush.bf16.msra.mxu0 %v3033_v4  ;;  %v3787_v25 = vld [vmem:[#allocation6 + $0x294] sm:$0xf]  ;;  %v3234_v8 = vld [vmem:[#allocation6 + $0x398] sm:$0xf0]  ;;  %v3226_v34 = vld [vmem:[#allocation6 + $0x388] sm:$0xf0] }
 0x457   :  { %1938 = vmatpush.bf16.msra.mxu2 %v3153_v9  ;;  %3028 = vmatmul.msk.bf16.vlgmr.msrb.gmra.mxu3 %vm1054_vm10, %v4663_v7  ;;  %v3074_v9 = vld [vmem:[#allocation6 + $0x258] sm:$0xf0]  ;;  %v3819_v62 = vld [vmem:[#allocation6 + $0x394] sm:$0xf] }
 0x458   :  { %1951 = vmatpush.bf16.msra.mxu3 %v3217_v26  ;;  %v3168_v26 = vld [vmem:[#allocation6 + $0x310] sm:$0xf]  ;;  %v3077_v30 = vor.u32 %v3779_v43, %v3074_v9  ;;  %v3194_v43 = vld [vmem:[#allocation6 + $0x348] sm:$0xf0]  ;;  %v3827_v9 = vld [vmem:[#allocation6 + $0x3d4] sm:$0xf] }
 0x459   :  { %1964 = vmatpush.bf16.msrb.mxu1 %v3281_v28  ;;  %v3232_v28 = vld [vmem:[#allocation6 + $0x390] sm:$0xf]  ;;  %v3169_v61 = vor.u32 %v3804_v27, %v3168_v26  ;;  %v3034_v26 = vld [vmem:[#allocation6 + $0x208] sm:$0xf0] }
 0x45a   :  { %1977 = vmatpush.bf16.msrb.mxu0 %v3093_v41  ;;  %v3233_v52 = vor.u32 %v3820_v37, %v3232_v28  ;;  %v3138_v41 = vld [vmem:[#allocation6 + $0x2d8] sm:$0xf0]  ;;  %v3037_v27 = vor.u32 %v3769_v33, %v3034_v26  ;;  %v3807_v28 = vld [vmem:[#allocation6 + $0x334] sm:$0xf]  ;;  %v3312_v26 = vld [vmem:[#allocation6 + $0x30] sm:$0xf] }
 0x45b   :  { %1939 = vmatpush.bf16.msra.mxu2 %v3145_v47  ;;  %v3786_v47 = vld [vmem:[#allocation6 + $0x284] sm:$0xf0]  ;;  %v3186_v37 = vld [vmem:[#allocation6 + $0x338] sm:$0xf0] }
 0x45c   :  { %1952 = vmatpush.bf16.msra.mxu3 %v3209_v51  ;;  %v3802_v51 = vld [vmem:[#allocation6 + $0x304] sm:$0xf0]  ;;  %v3097_v3 = vor.u32 %v3786_v47, %v3096_v44  ;;  %v3189_v38 = vor.u32 %v3807_v28, %v3186_v37  ;;  %v3258_v44 = vld [vmem:[#allocation6 + $0x3c8] sm:$0xf0] }
 0x45d   :  { %1965 = vmatpush.bf16.msrb.mxu1 %v3273_v48  ;;  %v3154_v48 = vld [vmem:[#allocation6 + $0x2f8] sm:$0xf0]  ;;  %v3161_v2 = vor.u32 %v3802_v51, %v3160_v50  ;;  %v3114_v50 = vld [vmem:[#allocation6 + $0x2a8] sm:$0xf0]  ;;  %v3805_v51 = vld [vmem:[#allocation6 + $0x324] sm:$0xf] }
 0x45e   :  { %1978 = vmatpush.bf16.msrb.mxu0 %v3085_v32  ;;  %v3157_v11 = vor.u32 %v3799_v54, %v3154_v48  ;;  %v3178_v54 = vld [vmem:[#allocation6 + $0x328] sm:$0xf0]  ;;  %v3250_v48 = vld [vmem:[#allocation6 + $0x3b8] sm:$0xf0] }
 0x45f   :  { %1940 = vmatpush.bf16.msra.mxu2 %v3137_v58  ;;  %v3775_v58 = vld [vmem:[#allocation6 + $0x234] sm:$0xf] }
 0x460   :  { %1953 = vmatpush.bf16.msra.mxu3 %v3201_v63  ;;  %3029 = vmatmul.msk.bf16.vlgmr.msra.gmra.mxu1 %vm1054_vm10, %v4663_v7  ;;  %v3177_v7 = vor.u32 %v3806_v36, %v3176_v14  ;;  %v3831_v63 = vld [vmem:[#allocation6 + $0x3f4] sm:$0xf]  ;;  %v3061_v4 = vor.u32 %v3775_v58, %v3058_v10  ;;  %v3042_v14 = vld [vmem:[#allocation6 + $0x218] sm:$0xf0]  ;;  %v3130_v36 = vld [vmem:[#allocation6 + $0x2c8] sm:$0xf0] }
 0x461   :  { %1966 = vmatpush.bf16.msrb.mxu1 %v3265_v59  ;;  %v3221_v59 = vor.u32 %v3815_v57, %v3218_v49  ;;  %v3045_v32 = vor.u32 %v3771_v24, %v3042_v14  ;;  %v3181_v57 = vor.u32 %v3805_v51, %v3178_v54  ;;  %v3803_v58 = vld [vmem:[#allocation6 + $0x314] sm:$0xf]  ;;  %v3170_v10 = vld [vmem:[#allocation6 + $0x318] sm:$0xf0]  ;;  %v3328_v14 = vld [vmem:[#allocation6 + $0x50] sm:$0xf] }
 0x462   :  { %1979 = vmatpush.bf16.msrb.mxu0 %v3077_v30  ;;  %v3122_v30 = vld [vmem:[#allocation6 + $0x2b8] sm:$0xf0] }
 0x463   :  { %1941 = vmatpush.bf16.msra.mxu2 %v3129_v39  ;;  %v3285_v39 = vor.u32 %v3831_v63, %v3282_v0  ;;  %v3821_v63 = vld [vmem:[#allocation6 + $0x3a4] sm:$0xf]  ;;  %v3242_v0 = vld [vmem:[#allocation6 + $0x3a8] sm:$0xf0] }
 0x464   :  { %1954 = vmatpush.bf16.msra.mxu3 %v3193_v40  ;;  %v3149_v40 = vor.u32 %v3797_v1, %v3146_v5  ;;  %v3801_v1 = vld [vmem:[#allocation6 + $0x304] sm:$0xf] }
 0x465   :  { %1967 = vmatpush.bf16.msrb.mxu1 %v3257_v16  ;;  %v3795_v16 = vld [vmem:[#allocation6 + $0x2d4] sm:$0xf] }
 0x466   :  { %1980 = vmatpush.bf16.msrb.mxu0 %v3069_v55  ;;  %v3141_v19 = vor.u32 %v3795_v16, %v3138_v41  ;;  %v3823_v55 = vld [vmem:[#allocation6 + $0x3b4] sm:$0xf]  ;;  %v3720_v41 = vld [vmem:[#allocation6 + $0x74] sm:$0xf0] }
 0x467   :  { %1942 = vmatpush.bf16.msra.mxu2 %v3121_v22  ;;  %v3829_v22 = vld [vmem:[#allocation6 + $0x3e4] sm:$0xf]  ;;  %v3253_v49 = vor.u32 %v3823_v55, %v3250_v48  ;;  %v3304_v55 = vld [vmem:[#allocation6 + $0x20] sm:$0xf]  ;;  %v3710_v48 = vld [vmem:[#allocation6 + $0x24] sm:$0xf0] }
 0x468   :  { %1955 = vmatpush.bf16.msra.mxu3 %v3185_v23  ;;  %v3274_v23 = vld [vmem:[#allocation6 + $0x3e8] sm:$0xf0] }
 0x469   :  { %1968 = vmatpush.bf16.msrb.mxu1 %v3249_v18  ;;  %v3277_v12 = vor.u32 %v3829_v22, %v3274_v23  ;;  %v3793_v18 = vld [vmem:[#allocation6 + $0x2c4] sm:$0xf]  ;;  %v3718_v22 = vld [vmem:[#allocation6 + $0x64] sm:$0xf0] }
 0x46a   :  { %1981 = vmatpush.bf16.msrb.mxu0 %v3061_v4  ;;  %v3133_v35 = vor.u32 %v3793_v18, %v3130_v36  ;;  %v3162_v4 = vld [vmem:[#allocation6 + $0x308] sm:$0xf0]  ;;  %v3716_v18 = vld [vmem:[#allocation6 + $0x54] sm:$0xf0] }
 0x46b   :  { %1943 = vmatpush.bf16.msra.mxu2 %v3113_v13  ;;  %v3197_v13 = vor.u32 %v3809_v20, %v3194_v43  ;;  %v3714_v20 = vld [vmem:[#allocation6 + $0x44] sm:$0xf0]  ;;  %v3408_v43 = vld [vmem:[#allocation6 + $0xf0] sm:$0xf] }
 0x46c   :  { %1956 = vmatpush.bf16.msra.mxu3 %v3177_v7  ;;  %v3266_v7 = vld [vmem:[#allocation6 + $0x3d8] sm:$0xf0] }
 0x46d   :  { %1969 = vmatpush.bf16.msrb.mxu1 %v3241_v45  ;;  %v3269_v31 = vor.u32 %v3827_v9, %v3266_v7  ;;  %v3791_v45 = vld [vmem:[#allocation6 + $0x2b4] sm:$0xf]  ;;  %v3736_v9 = vld [vmem:[#allocation6 + $0xf4] sm:$0xf0] }
 0x46e   :  { %1982 = vmatpush.bf16.msrb.mxu0 %v3053_v17  ;;  %v3125_v29 = vor.u32 %v3791_v45, %v3122_v30  ;;  %v3344_v17 = vld [vmem:[#allocation6 + $0x70] sm:$0xf]  ;;  %v3752_v7 = vld [vmem:[#allocation6 + $0x174] sm:$0xf0]  ;;  %v3409_v28 = vor.u32 %v3736_v9, %v3408_v43 }
 0x46f   :  { %1944 = vmatpush.bf16.msra.mxu2 %v3105_v46  ;;  %v3825_v46 = vld [vmem:[#allocation6 + $0x3c4] sm:$0xf]  ;;  %v3345_v60 = vor.u32 %v3720_v41, %v3344_v17  ;;  %v3712_v45 = vld [vmem:[#allocation6 + $0x34] sm:$0xf0]  ;;  %v3288_v17 = vld [vmem:[#allocation6] sm:$0xf] }
 0x470   :  { %1957 = vmatpush.bf16.msra.mxu3 %v3169_v61  ;;  %v3261_v47 = vor.u32 %v3825_v46, %v3258_v44  ;;  %v3789_v61 = vld [vmem:[#allocation6 + $0x2a4] sm:$0xf]  ;;  %v3768_v46 = vld [vmem:[#allocation6 + $0x1f4] sm:$0xf0] }
 0x471   :  { %1970 = vmatpush.bf16.msrb.mxu1 %v3233_v52  ;;  %v3117_v52 = vor.u32 %v3789_v61, %v3114_v50  ;;  %v3464_v61 = vld [vmem:[#allocation6 + $0x160] sm:$0xf]  ;;  %v3750_v50 = vld [vmem:[#allocation6 + $0x164] sm:$0xf0] }
 0x472   :  { %1983 = vmatpush.bf16.msrb.mxu0 %v3045_v32  ;;  %v3329_v32 = vor.u32 %v3716_v18, %v3328_v14  ;;  %v3512_v14 = vld [vmem:[#allocation6 + $0x1c0] sm:$0xf]  ;;  %v3762_v18 = vld [vmem:[#allocation6 + $0x1c4] sm:$0xf0] }
 0x473   :  { %1945 = vmatpush.bf16.msra.mxu2 %v3097_v3  ;;  %v3109_v3 = vor.u32 %v3787_v25, %v3106_v53  ;;  %v3465_v25 = vor.u32 %v3750_v50, %v3464_v61  ;;  %v3392_v53 = vld [vmem:[#allocation6 + $0xd0] sm:$0xf]  ;;  %v3724_v50 = vld [vmem:[#allocation6 + $0x94] sm:$0xf0] }
 0x474   :  { %1958 = vmatpush.bf16.msra.mxu3 %v3161_v2  ;;  %v3173_v2 = vor.u32 %v3803_v58, %v3170_v10  ;;  %v3528_v58 = vld [vmem:[#allocation6 + $0x1e0] sm:$0xf]  ;;  %v3732_v10 = vld [vmem:[#allocation6 + $0xd4] sm:$0xf0]  ;;  %v3360_v61 = vld [vmem:[#allocation6 + $0x90] sm:$0xf] }
 0x475   :  { %1971 = vmatpush.bf16.msrb.mxu1 %v3225_v6  ;;  %v3098_v6 = vld [vmem:[#allocation6 + $0x288] sm:$0xf0] }
 0x476   :  { %1984 = vmatpush.bf16.msrb.mxu0 %v3037_v27 }
 0x477   :  { %1990 = vmatpush.bf16.msrb.mxu2 %v3157_v11  ;;  %v3245_v11 = vor.u32 %v3821_v63, %v3242_v0  ;;  %v3456_v63 = vld [vmem:[#allocation6 + $0x150] sm:$0xf]  ;;  %v3748_v0 = vld [vmem:[#allocation6 + $0x154] sm:$0xf0] }
 0x478   :  { %2003 = vmatpush.bf16.msrb.mxu3 %v3221_v59  ;;  %v3785_v59 = vld [vmem:[#allocation6 + $0x284] sm:$0xf] }
 0x479   :  { %2016 = vmatpush.bf16.msra.mxu1 %v3285_v39  ;;  %v3101_v5 = vor.u32 %v3785_v59, %v3098_v6  ;;  %v3165_v39 = vor.u32 %v3801_v1, %v3162_v4  ;;  %v3296_v59 = vld [vmem:[#allocation6 + $0x10] sm:$0xf]  ;;  %v3708_v6 = vld [vmem:[#allocation6 + $0x14] sm:$0xf0]  ;;  %v3393_v1 = vor.u32 %v3732_v10, %v3392_v53  ;;  %v3384_v4 = vld [vmem:[#allocation6 + $0xc0] sm:$0xf] }
 0x47a   :  { %v3352_v53 = vld [vmem:[#allocation6 + $0x80] sm:$0xf] }
 0x47b   :  { %1991 = vmatpush.bf16.msrb.mxu2 %v3149_v40  ;;  %v3237_v40 = vor.u32 %v3819_v62, %v3234_v8  ;;  %v3520_v62 = vld [vmem:[#allocation6 + $0x1d0] sm:$0xf]  ;;  %v3764_v8 = vld [vmem:[#allocation6 + $0x1d4] sm:$0xf0] }
 0x47c   :  { %2004 = vmatpush.bf16.msrb.mxu3 %v3213_v15  ;;  %v3817_v15 = vld [vmem:[#allocation6 + $0x384] sm:$0xf] }
 0x47d   :  { %2017 = vmatpush.bf16.msra.mxu1 %v3277_v12  ;;  %v3229_v56 = vor.u32 %v3817_v15, %v3226_v34  ;;  %v3746_v15 = vld [vmem:[#allocation6 + $0x144] sm:$0xf0]  ;;  %v3297_v34 = vor.u32 %v3708_v6, %v3296_v59  ;;  %v3322_v59 = vld [vmem:[#allocation6 + $0x48] sm:$0xf0]  ;;  %v3735_v6 = vld [vmem:[#allocation6 + $0xf4] sm:$0xf] }
 0x47f   :  { %1992 = vmatpush.bf16.msrb.mxu2 %v3141_v19 }
 0x480   :  { %2005 = vmatpush.bf16.msrb.mxu3 %v3205_v21  ;;  %v3336_v21 = vld [vmem:[#allocation6 + $0x60] sm:$0xf] }
 0x481   :  { %2018 = vmatpush.bf16.msra.mxu1 %v3269_v31  ;;  %v3337_v24 = vor.u32 %v3718_v22, %v3336_v21  ;;  %v3728_v21 = vld [vmem:[#allocation6 + $0xb4] sm:$0xf0]  ;;  %v3440_v22 = vld [vmem:[#allocation6 + $0x130] sm:$0xf] }
 0x483   :  { %1993 = vmatpush.bf16.msrb.mxu2 %v3133_v35  ;;  %v3320_v35 = vld [vmem:[#allocation6 + $0x40] sm:$0xf] }
 0x484   :  { %2006 = vmatpush.bf16.msrb.mxu3 %v3197_v13  ;;  %v3472_v13 = vld [vmem:[#allocation6 + $0x170] sm:$0xf]  ;;  %v3321_v33 = vor.u32 %v3714_v20, %v3320_v35  ;;  %v3346_v35 = vld [vmem:[#allocation6 + $0x78] sm:$0xf0] }
 0x485   :  { %2019 = vmatpush.bf16.msra.mxu1 %v3261_v47  ;;  %v3473_v37 = vor.u32 %v3752_v7, %v3472_v13  ;;  %v3734_v47 = vld [vmem:[#allocation6 + $0xe4] sm:$0xf0]  ;;  %v3368_v13 = vld [vmem:[#allocation6 + $0xa0] sm:$0xf] }
 0x486   :  { %v3726_v7 = vld [vmem:[#allocation6 + $0xa4] sm:$0xf0] }
 0x487   :  { %1994 = vmatpush.bf16.msrb.mxu2 %v3125_v29  ;;  %v3400_v29 = vld [vmem:[#allocation6 + $0xe0] sm:$0xf] }
 0x488   :  { %2007 = vmatpush.bf16.msrb.mxu3 %v3189_v38  ;;  %v3536_v38 = vld [vmem:[#allocation6 + $0x1f0] sm:$0xf] }
 0x489   :  { %2020 = vmatpush.bf16.msra.mxu1 %v3253_v49  ;;  %v3537_v54 = vor.u32 %v3768_v46, %v3536_v38  ;;  %v3401_v49 = vor.u32 %v3734_v47, %v3400_v29  ;;  %v3338_v29 = vld [vmem:[#allocation6 + $0x68] sm:$0xf0]  ;;  %v3369_v46 = vor.u32 %v3726_v7, %v3368_v13  ;;  %v3709_v13 = vld [vmem:[#allocation6 + $0x24] sm:$0xf] }
 0x48a   :  { %v3306_v7 = vld [vmem:[#allocation6 + $0x28] sm:$0xf0] }
 0x48b   :  { %1995 = vmatpush.bf16.msrb.mxu2 %v3117_v52  ;;  %v3313_v52 = vor.u32 %v3712_v45, %v3312_v26  ;;  %v3432_v26 = vld [vmem:[#allocation6 + $0x120] sm:$0xf]  ;;  %v3742_v45 = vld [vmem:[#allocation6 + $0x124] sm:$0xf0] }
 0x48c   :  { %2008 = vmatpush.bf16.msrb.mxu3 %v3181_v57  ;;  %v3433_v47 = vor.u32 %v3742_v45, %v3432_v26  ;;  %v3747_v26 = vld [vmem:[#allocation6 + $0x154] sm:$0xf]  ;;  %v3765_v45 = vld [vmem:[#allocation6 + $0x1e4] sm:$0xf] }
 0x48d   :  { %2021 = vmatpush.bf16.msra.mxu1 %v3245_v11 }
 0x48f   :  { %1996 = vmatpush.bf16.msrb.mxu2 %v3109_v3  ;;  %v3766_v3 = vld [vmem:[#allocation6 + $0x1e4] sm:$0xf0] }
 0x490   :  { %2009 = vmatpush.bf16.msrb.mxu3 %v3173_v2  ;;  %v3305_v2 = vor.u32 %v3710_v48, %v3304_v55  ;;  %v3529_v11 = vor.u32 %v3766_v3, %v3528_v58  ;;  %v3496_v55 = vld [vmem:[#allocation6 + $0x1a0] sm:$0xf]  ;;  %v3330_v48 = vld [vmem:[#allocation6 + $0x58] sm:$0xf0]  ;;  %v3722_v58 = vld [vmem:[#allocation6 + $0x84] sm:$0xf0] }
 0x491   :  { %2022 = vmatpush.bf16.msra.mxu1 %v3237_v40  ;;  %v3448_v40 = vld [vmem:[#allocation6 + $0x140] sm:$0xf] }
 0x492   :  { %v3416_v3 = vld [vmem:[#allocation6 + $0x100] sm:$0xf] }
 0x493   :  { %1997 = vmatpush.bf16.msrb.mxu2 %v3101_v5  ;;  %v3457_v5 = vor.u32 %v3748_v0, %v3456_v63  ;;  %v3738_v0 = vld [vmem:[#allocation6 + $0x104] sm:$0xf0] }
 0x494   :  { %2010 = vmatpush.bf16.msrb.mxu3 %v3165_v39  ;;  %v3730_v39 = vld [vmem:[#allocation6 + $0xc4] sm:$0xf0] }
 0x495   :  { %2023 = vmatpush.bf16.msra.mxu1 %v3229_v56  ;;  %v3521_v56 = vor.u32 %v3764_v8, %v3520_v62  ;;  %v3385_v41 = vor.u32 %v3730_v39, %v3384_v4  ;;  %v3474_v4 = vld [vmem:[#allocation6 + $0x178] sm:$0xf0]  ;;  %v3353_v62 = vor.u32 %v3722_v58, %v3352_v53  ;;  %v3417_v8 = vor.u32 %v3738_v0, %v3416_v3  ;;  %v3727_v53 = vld [vmem:[#allocation6 + $0xb4] sm:$0xf]  ;;  %v3761_v0 = vld [vmem:[#allocation6 + $0x1c4] sm:$0xf] }
 0x496   :  { %v3378_v3 = vld [vmem:[#allocation6 + $0xb8] sm:$0xf0] }
 0x4cd   :  { %v4675_v16 = vpop.f32.mrf.mxu1 }
 0x4ce   :  { %v4696_v38 = vpack.c.bf16 %v4675_v16, %v4675_v16  ;;  %v3715_v16 = vld [vmem:[#allocation6 + $0x54] sm:$0xf] }
 0x4cf   :  { %v3333_v63 = vor.u32 %v3715_v16, %v3330_v48 }
 0x4d5   :  { %v1424_v42 = vpop.f32.mrf.mxu1 }
 0x4d6   :  { %v1473_v19 = vpack.c.bf16 %v1424_v42, %v1424_v42  ;;  %v3449_v42 = vor.u32 %v3746_v15, %v3448_v40  ;;  %v3480_v15 = vld [vmem:[#allocation6 + $0x180] sm:$0xf] }
 0x4d8   :  { %1933 = vmatmul.bf16.vlgmr.msra.gmra.mxu0 %v1473_v19 }
 0x4d9   :  { %2349 = vmatpush.bf16.msra.mxu0 %v3345_v60  ;;  %v4677_v23 = vpop.f32.mrf.mxu2  ;;  %v3706_v60 = vld [vmem:[#allocation6 + $0x4] sm:$0xf0] }
 0x4da   :  { %v4679_v12 = vpop.f32.mrf.mxu3  ;;  %v3289_v20 = vor.u32 %v3706_v60, %v3288_v17  ;;  %v3733_v60 = vld [vmem:[#allocation6 + $0xe4] sm:$0xf] }
 0x4dd   :  { %2350 = vmatpush.bf16.msra.mxu0 %v3337_v24  ;;  %v4681_v36 = vpop.f32.mrf.mxu1  ;;  %v3744_v24 = vld [vmem:[#allocation6 + $0x134] sm:$0xf0] }
 0x4de   :  { %v3441_v9 = vor.u32 %v3744_v24, %v3440_v22  ;;  %v3466_v22 = vld [vmem:[#allocation6 + $0x168] sm:$0xf0]  ;;  %v4702_v24 = vpack.c.bf16 %v4677_v23, %v4677_v23  ;;  %v3731_v23 = vld [vmem:[#allocation6 + $0xd4] sm:$0xf] }
 0x4e1   :  { %2351 = vmatpush.bf16.msra.mxu0 %v3329_v32  ;;  %v1438_v31 = vpop.f32.mrf.mxu2  ;;  %v3719_v32 = vld [vmem:[#allocation6 + $0x74] sm:$0xf] }
 0x4e2   :  { %v4683_v27 = vpack.c.bf16 %v1438_v31, %v1438_v31  ;;  %v1452_v30 = vpop.f32.mrf.mxu3  ;;  %v3513_v31 = vor.u32 %v3762_v18, %v3512_v14  ;;  %v3767_v14 = vld [vmem:[#allocation6 + $0x1f4] sm:$0xf]  ;;  %v3538_v18 = vld [vmem:[#allocation6 + $0x1f8] sm:$0xf0] }
 0x4e3   :  { %v4685_v44 = vpack.c.bf16 %v1452_v30, %v1452_v30  ;;  %v3504_v30 = vld [vmem:[#allocation6 + $0x1b0] sm:$0xf] }
 0x4e4   :  { %1946 = vmatmul.bf16.vlgmr.msra.gmra.mxu2 %v4683_v27 }
 0x4e5   :  { %1959 = vmatmul.bf16.vlgmr.msra.gmra.mxu3 %v4685_v44  ;;  %2352 = vmatpush.bf16.msra.mxu0 %v3321_v33  ;;  %v1466_v51 = vpop.f32.mrf.mxu1  ;;  %v3349_v33 = vor.u32 %v3719_v32, %v3346_v35  ;;  %v4706_v32 = vpack.c.bf16 %v4679_v12, %v4679_v12  ;;  %v3458_v12 = vld [vmem:[#allocation6 + $0x158] sm:$0xf0] }
 0x4e6   :  { %2362 = vmatpush.bf16.msra.mxu2 %v3409_v28  ;;  %2375 = vmatpush.bf16.msra.mxu3 %v3473_v37  ;;  %v4689_v57 = vpack.c.bf16 %v1466_v51, %v1466_v51  ;;  %v3760_v28 = vld [vmem:[#allocation6 + $0x1b4] sm:$0xf0]  ;;  %v3717_v37 = vld [vmem:[#allocation6 + $0x64] sm:$0xf] }
 0x4e7   :  { %v3505_v51 = vor.u32 %v3760_v28, %v3504_v30  ;;  %v3530_v30 = vld [vmem:[#allocation6 + $0x1e8] sm:$0xf0]  ;;  %v3309_v28 = vor.u32 %v3709_v13, %v3306_v7  ;;  %v3490_v13 = vld [vmem:[#allocation6 + $0x198] sm:$0xf0] }
 0x4e8   :  { %1972 = vmatmul.bf16.vlgmr.msrb.gmra.mxu1 %v4689_v57  ;;  %1985 = vmatmul.bf16.vlgmr.msrb.gmra.mxu0 %v1473_v19  ;;  %v3376_v19 = vld [vmem:[#allocation6 + $0xb0] sm:$0xf] }
 0x4e9   :  { %2353 = vmatpush.bf16.msra.mxu0 %v3313_v52  ;;  %2388 = vmatpush.bf16.msrb.mxu1 %v3537_v54  ;;  %v3377_v43 = vor.u32 %v3728_v21, %v3376_v19  ;;  %v3424_v52 = vld [vmem:[#allocation6 + $0x110] sm:$0xf]  ;;  %v3740_v54 = vld [vmem:[#allocation6 + $0x114] sm:$0xf0]  ;;  %v3402_v19 = vld [vmem:[#allocation6 + $0xe8] sm:$0xf0] }
 0x4ea   :  { %2363 = vmatpush.bf16.msra.mxu2 %v3401_v49  ;;  %2376 = vmatpush.bf16.msra.mxu3 %v3465_v25  ;;  %v3361_v49 = vor.u32 %v3724_v50, %v3360_v61  ;;  %v3425_v25 = vor.u32 %v3740_v54, %v3424_v52  ;;  %v3749_v21 = vld [vmem:[#allocation6 + $0x164] sm:$0xf]  ;;  %v3298_v61 = vld [vmem:[#allocation6 + $0x18] sm:$0xf0]  ;;  %v3450_v54 = vld [vmem:[#allocation6 + $0x148] sm:$0xf0] }
 0x4eb   :  { %v3729_v50 = vld [vmem:[#allocation6 + $0xc4] sm:$0xf] }
 0x4ec   :  { %v3745_v52 = vld [vmem:[#allocation6 + $0x144] sm:$0xf] }
 0x4ed   :  { %2354 = vmatpush.bf16.msra.mxu0 %v3305_v2  ;;  %2389 = vmatpush.bf16.msrb.mxu1 %v3529_v11  ;;  %v3488_v2 = vld [vmem:[#allocation6 + $0x190] sm:$0xf]  ;;  %v3756_v11 = vld [vmem:[#allocation6 + $0x194] sm:$0xf0]  ;;  %v3453_v48 = vor.u32 %v3745_v52, %v3450_v54 }
 0x4ee   :  { %2364 = vmatpush.bf16.msra.mxu2 %v3393_v1  ;;  %2377 = vmatpush.bf16.msra.mxu3 %v3457_v5  ;;  %v3410_v1 = vld [vmem:[#allocation6 + $0xf8] sm:$0xf0]  ;;  %v3751_v5 = vld [vmem:[#allocation6 + $0x174] sm:$0xf]  ;;  %v3489_v39 = vor.u32 %v3756_v11, %v3488_v2  ;;  %v3514_v2 = vld [vmem:[#allocation6 + $0x1c8] sm:$0xf0] }
 0x4ef   :  { %v3477_v17 = vor.u32 %v3751_v5, %v3474_v4  ;;  %v3370_v5 = vld [vmem:[#allocation6 + $0xa8] sm:$0xf0]  ;;  %v3741_v4 = vld [vmem:[#allocation6 + $0x124] sm:$0xf]  ;;  %v3835_v54 = vld [vmem:[#allocation7 + $0x10] sm:$0xff] }
 0x4f1   :  { %2355 = vmatpush.bf16.msra.mxu0 %v3297_v34  ;;  %2390 = vmatpush.bf16.msrb.mxu1 %v3521_v56  ;;  %v3754_v34 = vld [vmem:[#allocation6 + $0x184] sm:$0xf0]  ;;  %v3413_v56 = vor.u32 %v3735_v6, %v3410_v1  ;;  %v3725_v6 = vld [vmem:[#allocation6 + $0xa4] sm:$0xf]  ;;  %v3517_v1 = vor.u32 %v3761_v0, %v3514_v2 }
 0x4f2   :  { %2365 = vmatpush.bf16.msra.mxu2 %v3385_v41  ;;  %2378 = vmatpush.bf16.msra.mxu3 %v3449_v42  ;;  %v3711_v41 = vld [vmem:[#allocation6 + $0x34] sm:$0xf]  ;;  %v3314_v42 = vld [vmem:[#allocation6 + $0x38] sm:$0xf0]  ;;  %v3481_v35 = vor.u32 %v3754_v34, %v3480_v15 }
 0x4f3   :  { %v3723_v34 = vld [vmem:[#allocation6 + $0x94] sm:$0xf] }
 0x4f4   :  { %1998 = vmatmul.bf16.vlgmr.msrb.gmra.mxu2 %v4683_v27  ;;  %v3341_v27 = vor.u32 %v3717_v37, %v3338_v29  ;;  %v4712_v37 = vpack.c.bf16 %v4681_v36, %v4681_v36 }
 0x4f5   :  { %2011 = vmatmul.bf16.vlgmr.msrb.gmra.mxu3 %v4685_v44  ;;  %2356 = vmatpush.bf16.msra.mxu0 %v3289_v20  ;;  %v3758_v44 = vld [vmem:[#allocation6 + $0x1a4] sm:$0xf0]  ;;  %v3317_v20 = vor.u32 %v3711_v41, %v3314_v42  ;;  %v3739_v41 = vld [vmem:[#allocation6 + $0x114] sm:$0xf]  ;;  %v3426_v42 = vld [vmem:[#allocation6 + $0x118] sm:$0xf0] }
 0x4f6   :  { %2366 = vmatpush.bf16.msra.mxu2 %v3377_v43  ;;  %2379 = vmatpush.bf16.msra.mxu3 %v3441_v9  ;;  %v3497_v10 = vor.u32 %v3758_v44, %v3496_v55  ;;  %v3405_v43 = vor.u32 %v3733_v60, %v3402_v19  ;;  %v3469_v9 = vor.u32 %v3749_v21, %v3466_v22  ;;  %v3763_v55 = vld [vmem:[#allocation6 + $0x1d4] sm:$0xf]  ;;  %v3522_v44 = vld [vmem:[#allocation6 + $0x1d8] sm:$0xf0]  ;;  %v3757_v60 = vld [vmem:[#allocation6 + $0x1a4] sm:$0xf] }
 0x4f7   :  { %2391 = vmatpush.bf16.msrb.mxu1 %v3513_v31  ;;  %v3541_v31 = vor.u32 %v3767_v14, %v3538_v18  ;;  %v3525_v58 = vor.u32 %v3763_v55, %v3522_v44  ;;  %v3498_v19 = vld [vmem:[#allocation6 + $0x1a8] sm:$0xf0]  ;;  %v3429_v22 = vor.u32 %v3739_v41, %v3426_v42  ;;  %v3721_v14 = vld [vmem:[#allocation6 + $0x84] sm:$0xf]  ;;  %v3848_v55 = vld [vmem:[#allocation7 + $0x78] sm:$0xff] }
 0x4f8   :  { %2024 = vmatmul.bf16.vlgmr.msra.gmra.mxu1 %v4689_v57  ;;  %2357 = vmatmul.bf16.vlgmr.msra.gmra.mxu0 %v4696_v38  ;;  %v3713_v57 = vld [vmem:[#allocation6 + $0x44] sm:$0xf]  ;;  %v3501_v18 = vor.u32 %v3757_v60, %v3498_v19  ;;  %v3834_v44 = vld [vmem:[#allocation7 + $0x8] sm:$0xff] }
 0x4f9   :  { %2401 = vmatpush.bf16.msrb.mxu0 %v3349_v33  ;;  %v3325_v40 = vor.u32 %v3713_v57, %v3322_v59  ;;  %v3394_v33 = vld [vmem:[#allocation6 + $0xd8] sm:$0xf0]  ;;  %v3381_v57 = vor.u32 %v3727_v53, %v3378_v3  ;;  %v3846_v53 = vld [vmem:[#allocation7 + $0x68] sm:$0xff]  ;;  %v3845_v3 = vld [vmem:[#allocation7 + $0x60] sm:$0xff] }
 0x4fa   :  { %2367 = vmatpush.bf16.msra.mxu2 %v3369_v46  ;;  %2380 = vmatpush.bf16.msra.mxu3 %v3433_v47  ;;  %v3397_v29 = vor.u32 %v3731_v23, %v3394_v33  ;;  %v3461_v46 = vor.u32 %v3747_v26, %v3458_v12  ;;  %v3707_v47 = vld [vmem:[#allocation6 + $0x14] sm:$0xf]  ;;  %v3482_v33 = vld [vmem:[#allocation6 + $0x188] sm:$0xf0]  ;;  %v3840_v12 = vld [vmem:[#allocation7 + $0x38] sm:$0xff] }
 0x4fb   :  { %2392 = vmatpush.bf16.msrb.mxu1 %v3505_v51  ;;  %v3533_v51 = vor.u32 %v3765_v45, %v3530_v30  ;;  %v3301_v16 = vor.u32 %v3707_v47, %v3298_v61  ;;  %v3839_v30 = vld [vmem:[#allocation7 + $0x30] sm:$0xff]  ;;  %v3836_v47 = vld [vmem:[#allocation7 + $0x18] sm:$0xff]  ;;  %v3842_v42 = vld [vmem:[#allocation7 + $0x48] sm:$0xff] }
 0x4fd   :  { %2402 = vmatpush.bf16.msrb.mxu0 %v3341_v27  ;;  %v3386_v27 = vld [vmem:[#allocation6 + $0xc8] sm:$0xf0] }
 0x4fe   :  { %2368 = vmatpush.bf16.msra.mxu2 %v3361_v49  ;;  %2381 = vmatpush.bf16.msra.mxu3 %v3425_v25  ;;  %v3389_v36 = vor.u32 %v3729_v50, %v3386_v27  ;;  %v3705_v49 = vld [vmem:[#allocation6 + $0x4] sm:$0xf]  ;;  %v3290_v25 = vld [vmem:[#allocation6 + $0x8] sm:$0xf0] }
 0x4ff   :  { %2393 = vmatpush.bf16.msrb.mxu1 %v3497_v10  ;;  %v3743_v10 = vld [vmem:[#allocation6 + $0x134] sm:$0xf]  ;;  %v3293_v11 = vor.u32 %v3705_v49, %v3290_v25  ;;  %v3833_v49 = vld [vmem:[#allocation7] sm:$0xff] }
 0x501   :  { %2403 = vmatpush.bf16.msrb.mxu0 %v3333_v63  ;;  %v3442_v63 = vld [vmem:[#allocation6 + $0x138] sm:$0xf0] }
 0x502   :  { %2369 = vmatpush.bf16.msra.mxu2 %v3353_v62  ;;  %2382 = vmatpush.bf16.msra.mxu3 %v3417_v8  ;;  %v3445_v59 = vor.u32 %v3743_v10, %v3442_v63  ;;  %v3434_v62 = vld [vmem:[#allocation6 + $0x128] sm:$0xf0]  ;;  %v3759_v8 = vld [vmem:[#allocation6 + $0x1b4] sm:$0xf] }
 0x503   :  { %2394 = vmatpush.bf16.msrb.mxu1 %v3489_v39  ;;  %v3506_v39 = vld [vmem:[#allocation6 + $0x1b8] sm:$0xf0]  ;;  %v3437_v15 = vor.u32 %v3741_v4, %v3434_v62  ;;  %v2627_v62 = vld [vmem:[%s4729_s1 + $0x6] ss:$8 sm:$0x3] }
 0x505   :  { %2404 = vmatpush.bf16.msrb.mxu0 %v3325_v40  ;;  %2370 = vmatmul.bf16.vlgmr.msra.gmra.mxu2 %v4702_v24  ;;  %v3373_v40 = vor.u32 %v3725_v6, %v3370_v5 }
 0x506   :  { %2414 = vmatpush.bf16.msrb.mxu2 %v3413_v56  ;;  %2427 = vmatpush.bf16.msrb.mxu3 %v3477_v17  ;;  %v3509_v56 = vor.u32 %v3759_v8, %v3506_v39  ;;  %v3362_v17 = vld [vmem:[#allocation6 + $0x98] sm:$0xf0] }
 0x507   :  { %2383 = vmatmul.bf16.vlgmr.msra.gmra.mxu3 %v4706_v32  ;;  %2395 = vmatpush.bf16.msrb.mxu1 %v3481_v35  ;;  %v3365_v21 = vor.u32 %v3723_v34, %v3362_v17  ;;  %v3354_v35 = vld [vmem:[#allocation6 + $0x88] sm:$0xf0]  ;;  %v3843_v34 = vld [vmem:[#allocation7 + $0x50] sm:$0xff] }
 0x508   :  { %v3357_v7 = vor.u32 %v3721_v14, %v3354_v35 }
 0x509   :  { %2405 = vmatpush.bf16.msrb.mxu0 %v3317_v20  ;;  %v3737_v20 = vld [vmem:[#allocation6 + $0x104] sm:$0xf] }
 0x50a   :  { %2415 = vmatpush.bf16.msrb.mxu2 %v3405_v43  ;;  %2428 = vmatpush.bf16.msrb.mxu3 %v3469_v9  ;;  %v3418_v43 = vld [vmem:[#allocation6 + $0x108] sm:$0xf0]  ;;  %v3755_v9 = vld [vmem:[#allocation6 + $0x194] sm:$0xf] }
 0x50b   :  { %2440 = vmatpush.bf16.msra.mxu1 %v3541_v31  ;;  %v3421_v23 = vor.u32 %v3737_v20, %v3418_v43  ;;  %v3753_v31 = vld [vmem:[#allocation6 + $0x184] sm:$0xf] }
 0x50c   :  { %2396 = vmatmul.bf16.vlgmr.msrb.gmra.mxu1 %v4712_v37  ;;  %v3485_v26 = vor.u32 %v3753_v31, %v3482_v33  ;;  %v2455_v33 = vperm.slane %v2627_v62, 1 }
 0x50d   :  { %2406 = vmatpush.bf16.msrb.mxu0 %v3309_v28  ;;  %v3838_v28 = vld [vmem:[#allocation7 + $0x28] sm:$0xff] }
 0x50e   :  { %2416 = vmatpush.bf16.msrb.mxu2 %v3397_v29  ;;  %2429 = vmatpush.bf16.msrb.mxu3 %v3461_v46  ;;  %v3837_v46 = vld [vmem:[#allocation7 + $0x20] sm:$0xff] }
 0x50f   :  { %2441 = vmatpush.bf16.msra.mxu1 %v3533_v51 }
 0x511   :  { %2407 = vmatpush.bf16.msrb.mxu0 %v3301_v16  ;;  %v3847_v16 = vld [vmem:[#allocation7 + $0x70] sm:$0xff] }
 0x512   :  { %2417 = vmatpush.bf16.msrb.mxu2 %v3389_v36  ;;  %2430 = vmatpush.bf16.msrb.mxu3 %v3453_v48 }
 0x513   :  { %2442 = vmatpush.bf16.msra.mxu1 %v3525_v58 }
 0x515   :  { %2408 = vmatpush.bf16.msrb.mxu0 %v3293_v11  ;;  %v3844_v11 = vld [vmem:[#allocation7 + $0x58] sm:$0xff] }
 0x516   :  { %2418 = vmatpush.bf16.msrb.mxu2 %v3381_v57  ;;  %2431 = vmatpush.bf16.msrb.mxu3 %v3445_v59 }
 0x517   :  { %2443 = vmatpush.bf16.msra.mxu1 %v3517_v1 }
 0x518   :  { %2409 = vmatmul.bf16.vlgmr.msrb.gmra.mxu0 %v4696_v38  ;;  %v3493_v38 = vor.u32 %v3755_v9, %v3490_v13 }
 0x519   :  { %2590 = vmatpush.bf16.msra.mxu0 %v3840_v12 }
 0x51a   :  { %2419 = vmatpush.bf16.msrb.mxu2 %v3373_v40  ;;  %2432 = vmatpush.bf16.msrb.mxu3 %v3437_v15  ;;  %v2454_v15 = vperm.slane %v2627_v62, 0 }
 0x51b   :  { %2444 = vmatpush.bf16.msra.mxu1 %v3509_v56 }
 0x51d   :  { %2591 = vmatpush.bf16.msra.mxu0 %v3839_v30 }
 0x51e   :  { %2420 = vmatpush.bf16.msrb.mxu2 %v3365_v21  ;;  %2433 = vmatpush.bf16.msrb.mxu3 %v3429_v22  ;;  %v3841_v22 = vld [vmem:[#allocation7 + $0x40] sm:$0xff] }
 0x51f   :  { %2445 = vmatpush.bf16.msra.mxu1 %v3501_v18 }
 0x521   :  { %2592 = vmatpush.bf16.msra.mxu0 %v3838_v28 }
 0x522   :  { %2421 = vmatpush.bf16.msrb.mxu2 %v3357_v7  ;;  %2434 = vmatpush.bf16.msrb.mxu3 %v3421_v23 }
 0x523   :  { %2446 = vmatpush.bf16.msra.mxu1 %v3493_v38 }
 0x525   :  { %2422 = vmatmul.bf16.vlgmr.msrb.gmra.mxu2 %v4702_v24  ;;  %2435 = vmatmul.bf16.vlgmr.msrb.gmra.mxu3 %v4706_v32 }
 0x526   :  { %2593 = vmatpush.bf16.msra.mxu0 %v3837_v46  ;;  %2603 = vmatpush.bf16.msra.mxu2 %v3848_v55 }
 0x527   :  { %2447 = vmatpush.bf16.msra.mxu1 %v3485_v26 }
 0x52a   :  { %2448 = vmatmul.bf16.vlgmr.msra.gmra.mxu1 %v4712_v37  ;;  %2594 = vmatpush.bf16.msra.mxu0 %v3836_v47 }
 0x52b   :  { %2604 = vmatpush.bf16.msra.mxu2 %v3847_v16 }
 0x52e   :  { %2595 = vmatpush.bf16.msra.mxu0 %v3835_v54 }
 0x52f   :  { %2605 = vmatpush.bf16.msra.mxu2 %v3846_v53 }
 0x532   :  { %2596 = vmatpush.bf16.msra.mxu0 %v3834_v44 }
 0x533   :  { %2606 = vmatpush.bf16.msra.mxu2 %v3845_v3 }
 0x536   :  { %2597 = vmatpush.bf16.msra.mxu0 %v3833_v49 }
 0x537   :  { %2607 = vmatpush.bf16.msra.mxu2 %v3844_v11 }
 0x53b   :  { %2608 = vmatpush.bf16.msra.mxu2 %v3843_v34 }
 0x53f   :  { %2609 = vmatpush.bf16.msra.mxu2 %v3842_v42 }
 0x543   :  { %2610 = vmatpush.bf16.msra.mxu2 %v3841_v22 }
 0x555   :  { %v1934_v45 = vpop.f32.mrf.mxu0 }
 0x55d   :  { %v1936_v29 = vpop.f32.mrf.mxu0 }
 0x565   :  { %v1973_v61 = vpop.f32.mrf.mxu1  ;;  %v1986_v50 = vpop.f32.mrf.mxu0 }
 0x567   :  { %v1947_v51 = vpop.f32.mrf.mxu2 }
 0x568   :  { %v1960_v24 = vpop.f32.mrf.mxu3  ;;  %v1948_v10 = vadd.f32 %v1947_v51, %v1934_v45 }
 0x56a   :  { %v1961_v59 = vadd.f32 %v1960_v24, %v1948_v10 }
 0x56c   :  { %v1974_v6 = vadd.f32 %v1973_v61, %v1961_v59  ;;  %v120_v61 = vld [vmem:[%s4729_s1 + $0x7] ss:$0 sm:$0xff] }
 0x56d   :  { %v1975_v32 = vpop.f32.mrf.mxu1  ;;  %v1988_v27 = vpop.f32.mrf.mxu0 }
 0x56f   :  { %v1949_v52 = vpop.f32.mrf.mxu2 }
 0x570   :  { %v1962_v37 = vpop.f32.mrf.mxu3 }
 0x575   :  { %v2025_v36 = vpop.f32.mrf.mxu1  ;;  %v2358_v48 = vpop.f32.mrf.mxu0 }
 0x576   :  { %v2359_v1 = vadd.f32 %v2358_v48, %v1974_v6 }
 0x577   :  { %v1999_v25 = vpop.f32.mrf.mxu2 }
 0x578   :  { %v2012_v58 = vpop.f32.mrf.mxu3  ;;  %v2000_v18 = vadd.f32 %v1999_v25, %v1986_v50 }
 0x57a   :  { %v2013_v20 = vadd.f32 %v2012_v58, %v2000_v18 }
 0x57c   :  { %v2026_v43 = vadd.f32 %v2025_v36, %v2013_v20 }
 0x57d   :  { %v2027_v63 = vpop.f32.mrf.mxu1  ;;  %v2360_v0 = vpop.f32.mrf.mxu0 }
 0x57f   :  { %v2001_v2 = vpop.f32.mrf.mxu2 }
 0x580   :  { %v2014_v57 = vpop.f32.mrf.mxu3 }
 0x588   :  { %v2371_v4 = vpop.f32.mrf.mxu2 }
 0x589   :  { %v2397_v5 = vpop.f32.mrf.mxu1  ;;  %v2372_v39 = vadd.f32 %v2371_v4, %v2359_v1 }
 0x58a   :  { %v2384_v8 = vpop.f32.mrf.mxu3 }
 0x58b   :  { %v2385_v40 = vadd.f32 %v2384_v8, %v2372_v39 }
 0x58d   :  { %v2398_v56 = vadd.f32 %v2397_v5, %v2385_v40 }
 0x58f   :  { %v2458_v17 = vadd.f32 %v2454_v15, %v2398_v56 }
 0x590   :  { %v2373_v60 = vpop.f32.mrf.mxu2 }
 0x591   :  { %v2399_v41 = vpop.f32.mrf.mxu1  ;;  %v2460_v21 = vpack.c.bf16 %v2458_v17, %v2458_v17 }
 0x592   :  { %v2386_v19 = vpop.f32.mrf.mxu3 }
 0x593   :  { %2598 = vmatmul.bf16.vlgmr.msra.gmra.mxu0 %v2460_v21 }
 0x595   :  { %v2410_v14 = vpop.f32.mrf.mxu0 }
 0x596   :  { %v2411_v9 = vadd.f32 %v2410_v14, %v2026_v43 }
 0x59d   :  { %v2412_v35 = vpop.f32.mrf.mxu0 }
 0x5a7   :  { %v2449_v13 = vpop.f32.mrf.mxu1 }
 0x5a8   :  { %v2423_v7 = vpop.f32.mrf.mxu2  ;;  %v2436_v23 = vpop.f32.mrf.mxu3 }
 0x5a9   :  { %v2424_v38 = vadd.f32 %v2423_v7, %v2411_v9 }
 0x5ab   :  { %v2437_v31 = vadd.f32 %v2436_v23, %v2424_v38 }
 0x5ad   :  { %v2450_v26 = vadd.f32 %v2449_v13, %v2437_v31 }
 0x5af   :  { %v2459_v12 = vadd.f32 %v2455_v33, %v2450_v26  ;;  %v2451_v45 = vpop.f32.mrf.mxu1 }
 0x5b0   :  { %v2425_v30 = vpop.f32.mrf.mxu2  ;;  %v2438_v28 = vpop.f32.mrf.mxu3 }
 0x5b1   :  { %v2461_v29 = vpack.c.bf16 %v2459_v12, %v2459_v12 }
 0x5b3   :  { %2611 = vmatmul.bf16.vlgmr.msra.gmra.mxu2 %v2461_v29 }
 0x610   :  { %v2599_v46 = vpop.f32.mrf.mxu0 }
 0x611   :  { %v2600_v50 = vadd.f32 %v2599_v46, %v120_v61 }
 0x618   :  { %v2601_v47 = vpop.f32.mrf.mxu0 }
 0x636   :  { %v2612_v51 = vpop.f32.mrf.mxu2 }
 0x637   :  { %v2613_v24 = vadd.f32 %v2612_v51, %v2600_v50 }
 0x639   :  { %2616 = vst [vmem:[%s4736_s8] sm:$0xff] %v2613_v24 }
 0x63e   :  { %v2614_v32 = vpop.f32.mrf.mxu2 }
 0x63f   :  { %2621 = vsyncpa [#allocation3], 1 }
 0x640   :  { %2622 = vsyncpa [#allocation5], 1 }
 0x641   :  { %2623 = vsyncpa [#allocation8], 1 }

</bundles_post_ra>
